<compile_context>
chip_gen: v6e
topology: v6e:2x2x1
jax: 0.10.0
libtpu: 0.0.40
codegen_flags: <defaults>
</compile_context>

<pallas_src>
import math
import functools

import jax
import jax.numpy as jnp
from jax.experimental import pallas as pl
from jax.experimental.pallas import tpu as pltpu


# ----------------------------------------------------------------------------
# In-kernel helpers
# ----------------------------------------------------------------------------

def _collapse_last_two(x):
    """Row-major flatten of the last two dims: (B, M, N) -> (B, M*N).

    Implemented with static slices + lane-axis / sublane-axis concatenates
    (all robustly supported Mosaic ops) instead of jnp.reshape, so we do not
    depend on general shape-cast support for sub-128-lane minor dims.  This
    relayout runs on the XLU / load-store slots (idle here) and is what makes
    the final HBM-facing stores lane-dense (review item #1).
    """
    B, M, N = x.shape
    rows = [jnp.concatenate([x[b, i:i + 1, :] for i in range(M)], axis=-1)
            for b in range(B)]                      # B pieces of (1, M*N)
    return jnp.concatenate(rows, axis=0)            # (B, M*N)


def _attention_heads(q3, k3, v3, *, nb_heads, matmul_dtype, need_p):
    """Multi-head scaled-dot-product attention on VMEM-resident values.

    q3: (B, Tq, H) f32 (already scaled by 1/sqrt(head_dim));
    k3, v3: (B, Ts, H) f32.
    Returns o_flat (B, Tq*H) f32 and p_flat (B, nb_heads*Tq*Ts) f32 (or None).
    """
    B, Tq, H = q3.shape
    Ts = k3.shape[1]
    dh = H // nb_heads

    o_parts, p_parts = [], []
    # Static unroll over heads; inside each head the matmuls carry a batch
    # dimension over B, so the MXU sees nb_heads QK^T + nb_heads PV issues
    # total instead of B*nb_heads tiny ones (review: batch the head matmuls).
    for h in range(nb_heads):
        sl = slice(h * dh, (h + 1) * dh)
        q_h = q3[:, :, sl]                          # (B, Tq, dh) static lane slice
        k_h = k3[:, :, sl]
        v_h = v3[:, :, sl]

        # scores = Q K^T (q already scaled); optionally bf16-fed MXU, f32 acc.
        s = jnp.einsum("btd,bsd->bts",
                       q_h.astype(matmul_dtype), k_h.astype(matmul_dtype),
                       preferred_element_type=jnp.float32)       # (B, Tq, Ts)

        # Numerically-stable softmax, entirely in f32 (VPU/EUP; v5e-safe).
        # Exact division so the exposed p_attn rows sum to 1 (correctness fix:
        # the previous approximate reciprocal is gone).
        m = jnp.max(s, axis=-1, keepdims=True)
        e = jnp.exp(s - m)
        p = e / jnp.sum(e, axis=-1, keepdims=True)                # (B, Tq, Ts)

        o_parts.append(
            jnp.einsum("bts,bsd->btd",
                       p.astype(matmul_dtype), v_h.astype(matmul_dtype),
                       preferred_element_type=jnp.float32))       # (B, Tq, dh)
        if need_p:
            p_parts.append(p)

    # Merge heads in-register, then flatten to lane-dense rows for the stores.
    o_flat = _collapse_last_two(jnp.concatenate(o_parts, axis=-1))   # (B, Tq*H)
    p_flat = None
    if need_p:
        p_stack = jnp.concatenate(p_parts, axis=1)        # (B, nb_heads*Tq, Ts)
        p_flat = _collapse_last_two(p_stack)              # (B, nb_heads*Tq*Ts)
    return o_flat, p_flat


# ----------------------------------------------------------------------------
# Fused kernel: QKV projection(s) + multi-head attention, whole batch at once
# ----------------------------------------------------------------------------

def _mha_kernel(*refs, B, Tq, Ts, H, nb_heads, scale,
                fused_qkv, return_p, matmul_dtype):
    if fused_qkv:
        # Self-attention: single packed projection x @ [Wq|Wk|Wv] (96 lanes).
        x_ref, w_ref, b_ref = refs[:3]
        out_refs = refs[3:]
        proj = jnp.dot(x_ref[...], w_ref[...],
                       preferred_element_type=jnp.float32) + b_ref[...]
        q2 = proj[:, 0:H]
        k2 = proj[:, H:2 * H]
        v2 = proj[:, 2 * H:3 * H]
    else:
        (xq_ref, xk_ref, xv_ref,
         wq_ref, wk_ref, wv_ref,
         bq_ref, bk_ref, bv_ref) = refs[:9]
        out_refs = refs[9:]
        q2 = jnp.dot(xq_ref[...], wq_ref[...],
                     preferred_element_type=jnp.float32) + bq_ref[...]
        k2 = jnp.dot(xk_ref[...], wk_ref[...],
                     preferred_element_type=jnp.float32) + bk_ref[...]
        v2 = jnp.dot(xv_ref[...], wv_ref[...],
                     preferred_element_type=jnp.float32) + bv_ref[...]

    # Scale q once (cheaper than scaling every (Tq, Ts) score block).
    # (B*T, H) -> (B, T, H) is a leading/sublane-tile-aligned split (T == 8
    # here), i.e. a layout-trivial reshape.
    q3 = (q2 * scale).reshape(B, Tq, H)
    k3 = k2.reshape(B, Ts, H)
    v3 = v2.reshape(B, Ts, H)

    o_flat, p_flat = _attention_heads(
        q3, k3, v3, nb_heads=nb_heads, matmul_dtype=matmul_dtype,
        need_p=return_p)

    o_ref = out_refs[0]
    o_ref[...] = o_flat.astype(o_ref.dtype)          # one lane-dense store
    if return_p:
        p_ref = out_refs[1]
        p_ref[...] = p_flat.astype(p_ref.dtype)      # one lane-dense store


# ----------------------------------------------------------------------------
# Wrapper
# ----------------------------------------------------------------------------

def multi_headed_attention(params, queries, keys, values, nb_heads, mask=None,
                           *, return_p_attn=True, matmul_dtype=None,
                           p_dtype=jnp.float32):
    """Forward pass of MultiHeadedAttention (eval mode).

    queries: (B, Tq, query_size), keys: (B, Ts, key_size),
    values:  (B, Ts, value_size).
    Returns (o_attn (B, Tq, hidden), p_attn (B, nb_heads, Tq, Ts) or None).

    matmul_dtype: e.g. jnp.bfloat16 to feed the MXU (and DMA activations /
        weights) in bf16 with f32 accumulation -- recommended on v6e/v7x for
        larger shapes; softmax stays in f32 (v5e-safe).
    return_p_attn: set False to skip computing/storing attention probabilities
        (their HBM writeback dominates as sequences grow).
    """
    if mask is not None:
        # TODO(synk): mask support (masked_fill with -inf before softmax) is
        # not wired through the kernel; only the mask=None path is implemented.
        raise NotImplementedError("mask is not supported by the Pallas kernel")

    B, Tq, Dq = queries.shape
    Bk, Ts, Dk = keys.shape
    Dv = values.shape[-1]
    H = params["wq"].shape[1]
    assert H % nb_heads == 0 and B == Bk
    scale = 1.0 / math.sqrt(H // nb_heads)

    mxu_dt = (jnp.dtype(matmul_dtype) if matmul_dtype is not None
              else jnp.dtype(jnp.float32))

    # Self-attention fast path: pack [Wq|Wk|Wv] into one (D, 3H) weight at
    # trace time so the three projections collapse into a single, wider
    # (better lane-utilised) MXU matmul.
    fused_qkv = (queries is keys) and (keys is values) \
        and (Dq == Dk == Dv) and (Tq == Ts)

    kernel = functools.partial(
        _mha_kernel, B=B, Tq=Tq, Ts=Ts, H=H, nb_heads=nb_heads, scale=scale,
        fused_qkv=fused_qkv, return_p=return_p_attn, matmul_dtype=mxu_dt)

    zero2 = lambda i: (0, 0)

    o_struct = jax.ShapeDtypeStruct((B, Tq * H), jnp.float32)
    o_spec = pl.BlockSpec((B, Tq * H), zero2)
    if return_p_attn:
        out_shape = (o_struct,
                     jax.ShapeDtypeStruct((B, nb_heads * Tq * Ts), p_dtype))
        out_specs = (o_spec, pl.BlockSpec((B, nb_heads * Tq * Ts), zero2))
    else:
        out_shape = o_struct
        out_specs = o_spec

    if fused_qkv:
        x = queries.reshape(B * Tq, Dq).astype(mxu_dt)
        w = jnp.concatenate([params["wq"], params["wk"], params["wv"]],
                            axis=1).astype(mxu_dt)
        b = jnp.concatenate([params["bq"], params["bk"], params["bv"]],
                            axis=0).reshape(1, 3 * H).astype(jnp.float32)
        inputs = (x, w, b)
        in_specs = [pl.BlockSpec((B * Tq, Dq), zero2),
                    pl.BlockSpec((Dq, 3 * H), zero2),
                    pl.BlockSpec((1, 3 * H), zero2)]
    else:
        inputs = (queries.reshape(B * Tq, Dq).astype(mxu_dt),
                  keys.reshape(B * Ts, Dk).astype(mxu_dt),
                  values.reshape(B * Ts, Dv).astype(mxu_dt),
                  params["wq"].astype(mxu_dt),
                  params["wk"].astype(mxu_dt),
                  params["wv"].astype(mxu_dt),
                  params["bq"].reshape(1, H).astype(jnp.float32),
                  params["bk"].reshape(1, H).astype(jnp.float32),
                  params["bv"].reshape(1, H).astype(jnp.float32))
        in_specs = [pl.BlockSpec((B * Tq, Dq), zero2),
                    pl.BlockSpec((B * Ts, Dk), zero2),
                    pl.BlockSpec((B * Ts, Dv), zero2),
                    pl.BlockSpec((Dq, H), zero2),
                    pl.BlockSpec((Dk, H), zero2),
                    pl.BlockSpec((Dv, H), zero2),
                    pl.BlockSpec((1, H), zero2),
                    pl.BlockSpec((1, H), zero2),
                    pl.BlockSpec((1, H), zero2)]

    # Single grid step: the whole batch is processed in one kernel invocation
    # (no per-step pipeline overhead; all blocks equal the full array shapes).
    result = pl.pallas_call(
        kernel,
        out_shape=out_shape,
        grid=(1,),
        in_specs=in_specs,
        out_specs=out_specs,
        compiler_params=pltpu.CompilerParams(
            dimension_semantics=("arbitrary",)),
    )(*inputs)

    if return_p_attn:
        o_flat, p_flat = result
        p_attn = p_flat.reshape(B, nb_heads, Tq, Ts)   # free row-major reshape
    else:
        o_flat, p_attn = result, None
    o_attn = o_flat.reshape(B, Tq, H)                  # free row-major reshape
    return o_attn, p_attn


# ----------------------------------------------------------------------------
# Deterministic parameter init (mimics nn.Linear uniform(-1/sqrt(fan_in), ...))
# ----------------------------------------------------------------------------

def init_params(key, query_size, key_size, value_size, hidden_size):
    ks = jax.random.split(key, 6)

    def lin(kw, kb, fan_in, fan_out):
        bound = 1.0 / math.sqrt(fan_in)
        w = jax.random.uniform(kw, (fan_in, fan_out), jnp.float32, -bound, bound)
        b = jax.random.uniform(kb, (fan_out,), jnp.float32, -bound, bound)
        return w, b

    wq, bq = lin(ks[0], ks[1], query_size, hidden_size)
    wk, bk = lin(ks[2], ks[3], key_size, hidden_size)
    wv, bv = lin(ks[4], ks[5], value_size, hidden_size)
    return dict(wq=wq, bq=bq, wk=wk, bk=bk, wv=wv, bv=bv)


# ----------------------------------------------------------------------------
# Main
# ----------------------------------------------------------------------------

if __name__ == "__main__":
    B = 2
    T = 8            # target_len == source_len
    query_size = key_size = value_size = 16
    hidden_size = 32
    nb_heads = 4

    root = jax.random.PRNGKey(0)
    k_params, k_x, k_q, k_k, k_v = jax.random.split(root, 5)

    params = init_params(k_params, query_size, key_size, value_size, hidden_size)

    def ref_forward(q_in, k_in, v_in):
        q = q_in @ params["wq"] + params["bq"]
        k = k_in @ params["wk"] + params["bk"]
        v = v_in @ params["wv"] + params["bv"]
        d = hidden_size // nb_heads

        def sh(x):
            return x.reshape(B, -1, nb_heads, d).transpose(0, 2, 1, 3)

        q, k, v = sh(q), sh(k), sh(v)
        s = jnp.einsum("bhtd,bhsd->bhts", q, k) / math.sqrt(d)
        p = jax.nn.softmax(s, axis=-1)
        o = jnp.einsum("bhts,bhsd->bhtd", p, v)
        return o.transpose(0, 2, 1, 3).reshape(B, -1, hidden_size), p

    # 1) Self-attention (packed-QKV fast path), f32.
    x = jax.random.normal(k_x, (B, T, query_size), jnp.float32)
    o1, p1 = multi_headed_attention(params, x, x, x, nb_heads)
    jax.block_until_ready((o1, p1))
    o1_ref, p1_ref = ref_forward(x, x, x)
    assert o1.shape == (B, T, hidden_size)
    assert p1.shape == (B, nb_heads, T, T)
    assert jnp.allclose(o1, o1_ref, atol=2e-4, rtol=2e-4)
    assert jnp.allclose(p1, p1_ref, atol=2e-4, rtol=2e-4)
    # Exact softmax division: returned attention rows sum to 1.
    assert jnp.allclose(p1.sum(-1), 1.0, atol=1e-5)

    # 2) Cross-attention (separate projections path), f32.
    qs = jax.random.normal(k_q, (B, T, query_size), jnp.float32)
    ks = jax.random.normal(k_k, (B, T, key_size), jnp.float32)
    vs = jax.random.normal(k_v, (B, T, value_size), jnp.float32)
    o2, p2 = multi_headed_attention(params, qs, ks, vs, nb_heads)
    jax.block_until_ready((o2, p2))
    o2_ref, p2_ref = ref_forward(qs, ks, vs)
    assert jnp.allclose(o2, o2_ref, atol=2e-4, rtol=2e-4)
    assert jnp.allclose(p2, p2_ref, atol=2e-4, rtol=2e-4)

    # 3) bf16 MXU feed + skipped p writeback (loose sanity check only).
    o3, p3 = multi_headed_attention(params, x, x, x, nb_heads,
                                    return_p_attn=False,
                                    matmul_dtype=jnp.bfloat16)
    jax.block_until_ready(o3)
    assert p3 is None
    assert jnp.allclose(o3, o1_ref, atol=1e-1, rtol=1e-1)

    print("KERNEL_OK")
</pallas_src>

<mosaic_0001>
module attributes {stable_mosaic.version = 11 : i64} {
  func.func @_mha_kernel(%arg0: i32, %arg1: memref<16x16xf32, #tpu.memory_space<vmem>>, %arg2: memref<16x96xf32, #tpu.memory_space<vmem>>, %arg3: memref<1x96xf32, #tpu.memory_space<vmem>>, %arg4: memref<2x256xf32, #tpu.memory_space<vmem>>, %arg5: memref<2x256xf32, #tpu.memory_space<vmem>>) attributes {dimension_semantics = [#tpu.dimension_semantics<arbitrary>], iteration_bounds = array<i64: 1>, scalar_prefetch = 0 : i64, scratch_operands = 0 : i64, tpu.core_type = #tpu.core_type<tc>, window_params = [{pipeline_mode = #tpu.pipeline_mode<synchronous>, transform_indices = @transform_0, window_bounds = array<i64: 16, 16>}, {pipeline_mode = #tpu.pipeline_mode<synchronous>, transform_indices = @transform_1, window_bounds = array<i64: 16, 96>}, {pipeline_mode = #tpu.pipeline_mode<synchronous>, transform_indices = @transform_2, window_bounds = array<i64: 1, 96>}, {pipeline_mode = #tpu.pipeline_mode<synchronous>, transform_indices = @transform_3, window_bounds = array<i64: 2, 256>}, {pipeline_mode = #tpu.pipeline_mode<synchronous>, transform_indices = @transform_4, window_bounds = array<i64: 2, 256>}]} {
    %c0 = arith.constant 0 : index
    %c0_0 = arith.constant 0 : index
    %0 = vector.load %arg1[%c0, %c0_0] : memref<16x16xf32, #tpu.memory_space<vmem>>, vector<16x16xf32>
    %c0_1 = arith.constant 0 : index
    %c0_2 = arith.constant 0 : index
    %1 = vector.load %arg2[%c0_1, %c0_2] : memref<16x96xf32, #tpu.memory_space<vmem>>, vector<16x96xf32>
    %cst = arith.constant dense<0.000000e+00> : vector<16x96xf32>
    %2 = tpu.matmul %0, %1, %cst {dimension_numbers = #tpu.dot_dimension_numbers<[1], [0], [0], [1], [0, 0, 1, 1], [], []>} : vector<16x16xf32>, vector<16x96xf32>, vector<16x96xf32> -> vector<16x96xf32>
    %c0_3 = arith.constant 0 : index
    %c0_4 = arith.constant 0 : index
    %3 = vector.load %arg3[%c0_3, %c0_4] : memref<1x96xf32, #tpu.memory_space<vmem>>, vector<1x96xf32>
    %4 = vector.broadcast %3 : vector<1x96xf32> to vector<16x96xf32>
    %5 = arith.addf %2, %4 : vector<16x96xf32>
    %6 = vector.extract_strided_slice %5 {offsets = [0, 0], sizes = [16, 32], strides = [1, 1]} : vector<16x96xf32> to vector<16x32xf32>
    %7 = vector.extract_strided_slice %5 {offsets = [0, 32], sizes = [16, 32], strides = [1, 1]} : vector<16x96xf32> to vector<16x32xf32>
    %8 = vector.extract_strided_slice %5 {offsets = [0, 64], sizes = [16, 32], strides = [1, 1]} : vector<16x96xf32> to vector<16x32xf32>
    %cst_5 = arith.constant 0.353553385 : f32
    %9 = vector.broadcast %cst_5 : f32 to vector<16x32xf32>
    %10 = arith.mulf %6, %9 : vector<16x32xf32>
    %11 = vector.shape_cast %10 : vector<16x32xf32> to vector<2x8x32xf32>
    %12 = vector.shape_cast %7 : vector<16x32xf32> to vector<2x8x32xf32>
    %13 = vector.shape_cast %8 : vector<16x32xf32> to vector<2x8x32xf32>
    %14 = vector.extract_strided_slice %11 {offsets = [0, 0, 0], sizes = [2, 8, 8], strides = [1, 1, 1]} : vector<2x8x32xf32> to vector<2x8x8xf32>
    %15 = vector.extract_strided_slice %12 {offsets = [0, 0, 0], sizes = [2, 8, 8], strides = [1, 1, 1]} : vector<2x8x32xf32> to vector<2x8x8xf32>
    %16 = vector.extract_strided_slice %13 {offsets = [0, 0, 0], sizes = [2, 8, 8], strides = [1, 1, 1]} : vector<2x8x32xf32> to vector<2x8x8xf32>
    "tpu.trace_start"() <{level = 10 : i32, message = "btd,bsd->bts"}> : () -> ()
    %cst_6 = arith.constant dense<0.000000e+00> : vector<2x8x8xf32>
    %17 = tpu.matmul %14, %15, %cst_6 {dimension_numbers = #tpu.dot_dimension_numbers<[2], [2], [1], [1], [0, 0, 0, 1, 1, 1], [0], [0]>} : vector<2x8x8xf32>, vector<2x8x8xf32>, vector<2x8x8xf32> -> vector<2x8x8xf32>
    "tpu.trace_stop"() : () -> ()
    %cst_7 = arith.constant dense<0xFF800000> : vector<2x8xf32>
    %18 = vector.multi_reduction <maximumf>, %17, %cst_7 [2] : vector<2x8x8xf32> to vector<2x8xf32>
    %19 = vector.shape_cast %18 : vector<2x8xf32> to vector<2x8x1xf32>
    %20 = vector.broadcast %19 : vector<2x8x1xf32> to vector<2x8x8xf32>
    %21 = arith.subf %17, %20 : vector<2x8x8xf32>
    %22 = math.exp %21 : vector<2x8x8xf32>
    %cst_8 = arith.constant dense<0.000000e+00> : vector<2x8xf32>
    %23 = vector.multi_reduction <add>, %22, %cst_8 [2] : vector<2x8x8xf32> to vector<2x8xf32>
    %24 = vector.shape_cast %23 : vector<2x8xf32> to vector<2x8x1xf32>
    %25 = vector.broadcast %24 : vector<2x8x1xf32> to vector<2x8x8xf32>
    %26 = arith.divf %22, %25 : vector<2x8x8xf32>
    "tpu.trace_start"() <{level = 10 : i32, message = "bts,bsd->btd"}> : () -> ()
    %cst_9 = arith.constant dense<0.000000e+00> : vector<2x8x8xf32>
    %27 = tpu.matmul %26, %16, %cst_9 {dimension_numbers = #tpu.dot_dimension_numbers<[2], [1], [1], [2], [0, 0, 0, 1, 1, 2], [0], [0]>} : vector<2x8x8xf32>, vector<2x8x8xf32>, vector<2x8x8xf32> -> vector<2x8x8xf32>
    "tpu.trace_stop"() : () -> ()
    %28 = vector.extract_strided_slice %11 {offsets = [0, 0, 8], sizes = [2, 8, 8], strides = [1, 1, 1]} : vector<2x8x32xf32> to vector<2x8x8xf32>
    %29 = vector.extract_strided_slice %12 {offsets = [0, 0, 8], sizes = [2, 8, 8], strides = [1, 1, 1]} : vector<2x8x32xf32> to vector<2x8x8xf32>
    %30 = vector.extract_strided_slice %13 {offsets = [0, 0, 8], sizes = [2, 8, 8], strides = [1, 1, 1]} : vector<2x8x32xf32> to vector<2x8x8xf32>
    "tpu.trace_start"() <{level = 10 : i32, message = "btd,bsd->bts"}> : () -> ()
    %cst_10 = arith.constant dense<0.000000e+00> : vector<2x8x8xf32>
    %31 = tpu.matmul %28, %29, %cst_10 {dimension_numbers = #tpu.dot_dimension_numbers<[2], [2], [1], [1], [0, 0, 0, 1, 1, 1], [0], [0]>} : vector<2x8x8xf32>, vector<2x8x8xf32>, vector<2x8x8xf32> -> vector<2x8x8xf32>
    "tpu.trace_stop"() : () -> ()
    %cst_11 = arith.constant dense<0xFF800000> : vector<2x8xf32>
    %32 = vector.multi_reduction <maximumf>, %31, %cst_11 [2] : vector<2x8x8xf32> to vector<2x8xf32>
    %33 = vector.shape_cast %32 : vector<2x8xf32> to vector<2x8x1xf32>
    %34 = vector.broadcast %33 : vector<2x8x1xf32> to vector<2x8x8xf32>
    %35 = arith.subf %31, %34 : vector<2x8x8xf32>
    %36 = math.exp %35 : vector<2x8x8xf32>
    %cst_12 = arith.constant dense<0.000000e+00> : vector<2x8xf32>
    %37 = vector.multi_reduction <add>, %36, %cst_12 [2] : vector<2x8x8xf32> to vector<2x8xf32>
    %38 = vector.shape_cast %37 : vector<2x8xf32> to vector<2x8x1xf32>
    %39 = vector.broadcast %38 : vector<2x8x1xf32> to vector<2x8x8xf32>
    %40 = arith.divf %36, %39 : vector<2x8x8xf32>
    "tpu.trace_start"() <{level = 10 : i32, message = "bts,bsd->btd"}> : () -> ()
    %cst_13 = arith.constant dense<0.000000e+00> : vector<2x8x8xf32>
    %41 = tpu.matmul %40, %30, %cst_13 {dimension_numbers = #tpu.dot_dimension_numbers<[2], [1], [1], [2], [0, 0, 0, 1, 1, 2], [0], [0]>} : vector<2x8x8xf32>, vector<2x8x8xf32>, vector<2x8x8xf32> -> vector<2x8x8xf32>
    "tpu.trace_stop"() : () -> ()
    %42 = vector.extract_strided_slice %11 {offsets = [0, 0, 16], sizes = [2, 8, 8], strides = [1, 1, 1]} : vector<2x8x32xf32> to vector<2x8x8xf32>
    %43 = vector.extract_strided_slice %12 {offsets = [0, 0, 16], sizes = [2, 8, 8], strides = [1, 1, 1]} : vector<2x8x32xf32> to vector<2x8x8xf32>
    %44 = vector.extract_strided_slice %13 {offsets = [0, 0, 16], sizes = [2, 8, 8], strides = [1, 1, 1]} : vector<2x8x32xf32> to vector<2x8x8xf32>
    "tpu.trace_start"() <{level = 10 : i32, message = "btd,bsd->bts"}> : () -> ()
    %cst_14 = arith.constant dense<0.000000e+00> : vector<2x8x8xf32>
    %45 = tpu.matmul %42, %43, %cst_14 {dimension_numbers = #tpu.dot_dimension_numbers<[2], [2], [1], [1], [0, 0, 0, 1, 1, 1], [0], [0]>} : vector<2x8x8xf32>, vector<2x8x8xf32>, vector<2x8x8xf32> -> vector<2x8x8xf32>
    "tpu.trace_stop"() : () -> ()
    %cst_15 = arith.constant dense<0xFF800000> : vector<2x8xf32>
    %46 = vector.multi_reduction <maximumf>, %45, %cst_15 [2] : vector<2x8x8xf32> to vector<2x8xf32>
    %47 = vector.shape_cast %46 : vector<2x8xf32> to vector<2x8x1xf32>
    %48 = vector.broadcast %47 : vector<2x8x1xf32> to vector<2x8x8xf32>
    %49 = arith.subf %45, %48 : vector<2x8x8xf32>
    %50 = math.exp %49 : vector<2x8x8xf32>
    %cst_16 = arith.constant dense<0.000000e+00> : vector<2x8xf32>
    %51 = vector.multi_reduction <add>, %50, %cst_16 [2] : vector<2x8x8xf32> to vector<2x8xf32>
    %52 = vector.shape_cast %51 : vector<2x8xf32> to vector<2x8x1xf32>
    %53 = vector.broadcast %52 : vector<2x8x1xf32> to vector<2x8x8xf32>
    %54 = arith.divf %50, %53 : vector<2x8x8xf32>
    "tpu.trace_start"() <{level = 10 : i32, message = "bts,bsd->btd"}> : () -> ()
    %cst_17 = arith.constant dense<0.000000e+00> : vector<2x8x8xf32>
    %55 = tpu.matmul %54, %44, %cst_17 {dimension_numbers = #tpu.dot_dimension_numbers<[2], [1], [1], [2], [0, 0, 0, 1, 1, 2], [0], [0]>} : vector<2x8x8xf32>, vector<2x8x8xf32>, vector<2x8x8xf32> -> vector<2x8x8xf32>
    "tpu.trace_stop"() : () -> ()
    %56 = vector.extract_strided_slice %11 {offsets = [0, 0, 24], sizes = [2, 8, 8], strides = [1, 1, 1]} : vector<2x8x32xf32> to vector<2x8x8xf32>
    %57 = vector.extract_strided_slice %12 {offsets = [0, 0, 24], sizes = [2, 8, 8], strides = [1, 1, 1]} : vector<2x8x32xf32> to vector<2x8x8xf32>
    %58 = vector.extract_strided_slice %13 {offsets = [0, 0, 24], sizes = [2, 8, 8], strides = [1, 1, 1]} : vector<2x8x32xf32> to vector<2x8x8xf32>
    "tpu.trace_start"() <{level = 10 : i32, message = "btd,bsd->bts"}> : () -> ()
    %cst_18 = arith.constant dense<0.000000e+00> : vector<2x8x8xf32>
    %59 = tpu.matmul %56, %57, %cst_18 {dimension_numbers = #tpu.dot_dimension_numbers<[2], [2], [1], [1], [0, 0, 0, 1, 1, 1], [0], [0]>} : vector<2x8x8xf32>, vector<2x8x8xf32>, vector<2x8x8xf32> -> vector<2x8x8xf32>
    "tpu.trace_stop"() : () -> ()
    %cst_19 = arith.constant dense<0xFF800000> : vector<2x8xf32>
    %60 = vector.multi_reduction <maximumf>, %59, %cst_19 [2] : vector<2x8x8xf32> to vector<2x8xf32>
    %61 = vector.shape_cast %60 : vector<2x8xf32> to vector<2x8x1xf32>
    %62 = vector.broadcast %61 : vector<2x8x1xf32> to vector<2x8x8xf32>
    %63 = arith.subf %59, %62 : vector<2x8x8xf32>
    %64 = math.exp %63 : vector<2x8x8xf32>
    %cst_20 = arith.constant dense<0.000000e+00> : vector<2x8xf32>
    %65 = vector.multi_reduction <add>, %64, %cst_20 [2] : vector<2x8x8xf32> to vector<2x8xf32>
    %66 = vector.shape_cast %65 : vector<2x8xf32> to vector<2x8x1xf32>
    %67 = vector.broadcast %66 : vector<2x8x1xf32> to vector<2x8x8xf32>
    %68 = arith.divf %64, %67 : vector<2x8x8xf32>
    "tpu.trace_start"() <{level = 10 : i32, message = "bts,bsd->btd"}> : () -> ()
    %cst_21 = arith.constant dense<0.000000e+00> : vector<2x8x8xf32>
    %69 = tpu.matmul %68, %58, %cst_21 {dimension_numbers = #tpu.dot_dimension_numbers<[2], [1], [1], [2], [0, 0, 0, 1, 1, 2], [0], [0]>} : vector<2x8x8xf32>, vector<2x8x8xf32>, vector<2x8x8xf32> -> vector<2x8x8xf32>
    "tpu.trace_stop"() : () -> ()
    %70 = tpu.concatenate %27, %41, %55, %69 in 2 : vector<2x8x8xf32>, vector<2x8x8xf32>, vector<2x8x8xf32>, vector<2x8x8xf32> -> vector<2x8x32xf32>
    %71 = vector.extract_strided_slice %70 {offsets = [0, 0, 0], sizes = [1, 1, 32], strides = [1, 1, 1]} : vector<2x8x32xf32> to vector<1x1x32xf32>
    %72 = vector.shape_cast %71 : vector<1x1x32xf32> to vector<1x32xf32>
    %73 = vector.extract_strided_slice %70 {offsets = [0, 1, 0], sizes = [1, 1, 32], strides = [1, 1, 1]} : vector<2x8x32xf32> to vector<1x1x32xf32>
    %74 = vector.shape_cast %73 : vector<1x1x32xf32> to vector<1x32xf32>
    %75 = vector.extract_strided_slice %70 {offsets = [0, 2, 0], sizes = [1, 1, 32], strides = [1, 1, 1]} : vector<2x8x32xf32> to vector<1x1x32xf32>
    %76 = vector.shape_cast %75 : vector<1x1x32xf32> to vector<1x32xf32>
    %77 = vector.extract_strided_slice %70 {offsets = [0, 3, 0], sizes = [1, 1, 32], strides = [1, 1, 1]} : vector<2x8x32xf32> to vector<1x1x32xf32>
    %78 = vector.shape_cast %77 : vector<1x1x32xf32> to vector<1x32xf32>
    %79 = vector.extract_strided_slice %70 {offsets = [0, 4, 0], sizes = [1, 1, 32], strides = [1, 1, 1]} : vector<2x8x32xf32> to vector<1x1x32xf32>
    %80 = vector.shape_cast %79 : vector<1x1x32xf32> to vector<1x32xf32>
    %81 = vector.extract_strided_slice %70 {offsets = [0, 5, 0], sizes = [1, 1, 32], strides = [1, 1, 1]} : vector<2x8x32xf32> to vector<1x1x32xf32>
    %82 = vector.shape_cast %81 : vector<1x1x32xf32> to vector<1x32xf32>
    %83 = vector.extract_strided_slice %70 {offsets = [0, 6, 0], sizes = [1, 1, 32], strides = [1, 1, 1]} : vector<2x8x32xf32> to vector<1x1x32xf32>
    %84 = vector.shape_cast %83 : vector<1x1x32xf32> to vector<1x32xf32>
    %85 = vector.extract_strided_slice %70 {offsets = [0, 7, 0], sizes = [1, 1, 32], strides = [1, 1, 1]} : vector<2x8x32xf32> to vector<1x1x32xf32>
    %86 = vector.shape_cast %85 : vector<1x1x32xf32> to vector<1x32xf32>
    %87 = tpu.concatenate %72, %74, %76, %78, %80, %82, %84, %86 in 1 : vector<1x32xf32>, vector<1x32xf32>, vector<1x32xf32>, vector<1x32xf32>, vector<1x32xf32>, vector<1x32xf32>, vector<1x32xf32>, vector<1x32xf32> -> vector<1x256xf32>
    %88 = vector.extract_strided_slice %70 {offsets = [1, 0, 0], sizes = [1, 1, 32], strides = [1, 1, 1]} : vector<2x8x32xf32> to vector<1x1x32xf32>
    %89 = vector.shape_cast %88 : vector<1x1x32xf32> to vector<1x32xf32>
    %90 = vector.extract_strided_slice %70 {offsets = [1, 1, 0], sizes = [1, 1, 32], strides = [1, 1, 1]} : vector<2x8x32xf32> to vector<1x1x32xf32>
    %91 = vector.shape_cast %90 : vector<1x1x32xf32> to vector<1x32xf32>
    %92 = vector.extract_strided_slice %70 {offsets = [1, 2, 0], sizes = [1, 1, 32], strides = [1, 1, 1]} : vector<2x8x32xf32> to vector<1x1x32xf32>
    %93 = vector.shape_cast %92 : vector<1x1x32xf32> to vector<1x32xf32>
    %94 = vector.extract_strided_slice %70 {offsets = [1, 3, 0], sizes = [1, 1, 32], strides = [1, 1, 1]} : vector<2x8x32xf32> to vector<1x1x32xf32>
    %95 = vector.shape_cast %94 : vector<1x1x32xf32> to vector<1x32xf32>
    %96 = vector.extract_strided_slice %70 {offsets = [1, 4, 0], sizes = [1, 1, 32], strides = [1, 1, 1]} : vector<2x8x32xf32> to vector<1x1x32xf32>
    %97 = vector.shape_cast %96 : vector<1x1x32xf32> to vector<1x32xf32>
    %98 = vector.extract_strided_slice %70 {offsets = [1, 5, 0], sizes = [1, 1, 32], strides = [1, 1, 1]} : vector<2x8x32xf32> to vector<1x1x32xf32>
    %99 = vector.shape_cast %98 : vector<1x1x32xf32> to vector<1x32xf32>
    %100 = vector.extract_strided_slice %70 {offsets = [1, 6, 0], sizes = [1, 1, 32], strides = [1, 1, 1]} : vector<2x8x32xf32> to vector<1x1x32xf32>
    %101 = vector.shape_cast %100 : vector<1x1x32xf32> to vector<1x32xf32>
    %102 = vector.extract_strided_slice %70 {offsets = [1, 7, 0], sizes = [1, 1, 32], strides = [1, 1, 1]} : vector<2x8x32xf32> to vector<1x1x32xf32>
    %103 = vector.shape_cast %102 : vector<1x1x32xf32> to vector<1x32xf32>
    %104 = tpu.concatenate %89, %91, %93, %95, %97, %99, %101, %103 in 1 : vector<1x32xf32>, vector<1x32xf32>, vector<1x32xf32>, vector<1x32xf32>, vector<1x32xf32>, vector<1x32xf32>, vector<1x32xf32>, vector<1x32xf32> -> vector<1x256xf32>
    %105 = tpu.concatenate %87, %104 in 0 : vector<1x256xf32>, vector<1x256xf32> -> vector<2x256xf32>
    %106 = tpu.concatenate %26, %40, %54, %68 in 1 : vector<2x8x8xf32>, vector<2x8x8xf32>, vector<2x8x8xf32>, vector<2x8x8xf32> -> vector<2x32x8xf32>
    %107 = vector.extract_strided_slice %106 {offsets = [0, 0, 0], sizes = [1, 1, 8], strides = [1, 1, 1]} : vector<2x32x8xf32> to vector<1x1x8xf32>
    %108 = vector.shape_cast %107 : vector<1x1x8xf32> to vector<1x8xf32>
    %109 = vector.extract_strided_slice %106 {offsets = [0, 1, 0], sizes = [1, 1, 8], strides = [1, 1, 1]} : vector<2x32x8xf32> to vector<1x1x8xf32>
    %110 = vector.shape_cast %109 : vector<1x1x8xf32> to vector<1x8xf32>
    %111 = vector.extract_strided_slice %106 {offsets = [0, 2, 0], sizes = [1, 1, 8], strides = [1, 1, 1]} : vector<2x32x8xf32> to vector<1x1x8xf32>
    %112 = vector.shape_cast %111 : vector<1x1x8xf32> to vector<1x8xf32>
    %113 = vector.extract_strided_slice %106 {offsets = [0, 3, 0], sizes = [1, 1, 8], strides = [1, 1, 1]} : vector<2x32x8xf32> to vector<1x1x8xf32>
    %114 = vector.shape_cast %113 : vector<1x1x8xf32> to vector<1x8xf32>
    %115 = vector.extract_strided_slice %106 {offsets = [0, 4, 0], sizes = [1, 1, 8], strides = [1, 1, 1]} : vector<2x32x8xf32> to vector<1x1x8xf32>
    %116 = vector.shape_cast %115 : vector<1x1x8xf32> to vector<1x8xf32>
    %117 = vector.extract_strided_slice %106 {offsets = [0, 5, 0], sizes = [1, 1, 8], strides = [1, 1, 1]} : vector<2x32x8xf32> to vector<1x1x8xf32>
    %118 = vector.shape_cast %117 : vector<1x1x8xf32> to vector<1x8xf32>
    %119 = vector.extract_strided_slice %106 {offsets = [0, 6, 0], sizes = [1, 1, 8], strides = [1, 1, 1]} : vector<2x32x8xf32> to vector<1x1x8xf32>
    %120 = vector.shape_cast %119 : vector<1x1x8xf32> to vector<1x8xf32>
    %121 = vector.extract_strided_slice %106 {offsets = [0, 7, 0], sizes = [1, 1, 8], strides = [1, 1, 1]} : vector<2x32x8xf32> to vector<1x1x8xf32>
    %122 = vector.shape_cast %121 : vector<1x1x8xf32> to vector<1x8xf32>
    %123 = vector.extract_strided_slice %106 {offsets = [0, 8, 0], sizes = [1, 1, 8], strides = [1, 1, 1]} : vector<2x32x8xf32> to vector<1x1x8xf32>
    %124 = vector.shape_cast %123 : vector<1x1x8xf32> to vector<1x8xf32>
    %125 = vector.extract_strided_slice %106 {offsets = [0, 9, 0], sizes = [1, 1, 8], strides = [1, 1, 1]} : vector<2x32x8xf32> to vector<1x1x8xf32>
    %126 = vector.shape_cast %125 : vector<1x1x8xf32> to vector<1x8xf32>
    %127 = vector.extract_strided_slice %106 {offsets = [0, 10, 0], sizes = [1, 1, 8], strides = [1, 1, 1]} : vector<2x32x8xf32> to vector<1x1x8xf32>
    %128 = vector.shape_cast %127 : vector<1x1x8xf32> to vector<1x8xf32>
    %129 = vector.extract_strided_slice %106 {offsets = [0, 11, 0], sizes = [1, 1, 8], strides = [1, 1, 1]} : vector<2x32x8xf32> to vector<1x1x8xf32>
    %130 = vector.shape_cast %129 : vector<1x1x8xf32> to vector<1x8xf32>
    %131 = vector.extract_strided_slice %106 {offsets = [0, 12, 0], sizes = [1, 1, 8], strides = [1, 1, 1]} : vector<2x32x8xf32> to vector<1x1x8xf32>
    %132 = vector.shape_cast %131 : vector<1x1x8xf32> to vector<1x8xf32>
    %133 = vector.extract_strided_slice %106 {offsets = [0, 13, 0], sizes = [1, 1, 8], strides = [1, 1, 1]} : vector<2x32x8xf32> to vector<1x1x8xf32>
    %134 = vector.shape_cast %133 : vector<1x1x8xf32> to vector<1x8xf32>
    %135 = vector.extract_strided_slice %106 {offsets = [0, 14, 0], sizes = [1, 1, 8], strides = [1, 1, 1]} : vector<2x32x8xf32> to vector<1x1x8xf32>
    %136 = vector.shape_cast %135 : vector<1x1x8xf32> to vector<1x8xf32>
    %137 = vector.extract_strided_slice %106 {offsets = [0, 15, 0], sizes = [1, 1, 8], strides = [1, 1, 1]} : vector<2x32x8xf32> to vector<1x1x8xf32>
    %138 = vector.shape_cast %137 : vector<1x1x8xf32> to vector<1x8xf32>
    %139 = vector.extract_strided_slice %106 {offsets = [0, 16, 0], sizes = [1, 1, 8], strides = [1, 1, 1]} : vector<2x32x8xf32> to vector<1x1x8xf32>
    %140 = vector.shape_cast %139 : vector<1x1x8xf32> to vector<1x8xf32>
    %141 = vector.extract_strided_slice %106 {offsets = [0, 17, 0], sizes = [1, 1, 8], strides = [1, 1, 1]} : vector<2x32x8xf32> to vector<1x1x8xf32>
    %142 = vector.shape_cast %141 : vector<1x1x8xf32> to vector<1x8xf32>
    %143 = vector.extract_strided_slice %106 {offsets = [0, 18, 0], sizes = [1, 1, 8], strides = [1, 1, 1]} : vector<2x32x8xf32> to vector<1x1x8xf32>
    %144 = vector.shape_cast %143 : vector<1x1x8xf32> to vector<1x8xf32>
    %145 = vector.extract_strided_slice %106 {offsets = [0, 19, 0], sizes = [1, 1, 8], strides = [1, 1, 1]} : vector<2x32x8xf32> to vector<1x1x8xf32>
    %146 = vector.shape_cast %145 : vector<1x1x8xf32> to vector<1x8xf32>
    %147 = vector.extract_strided_slice %106 {offsets = [0, 20, 0], sizes = [1, 1, 8], strides = [1, 1, 1]} : vector<2x32x8xf32> to vector<1x1x8xf32>
    %148 = vector.shape_cast %147 : vector<1x1x8xf32> to vector<1x8xf32>
    %149 = vector.extract_strided_slice %106 {offsets = [0, 21, 0], sizes = [1, 1, 8], strides = [1, 1, 1]} : vector<2x32x8xf32> to vector<1x1x8xf32>
    %150 = vector.shape_cast %149 : vector<1x1x8xf32> to vector<1x8xf32>
    %151 = vector.extract_strided_slice %106 {offsets = [0, 22, 0], sizes = [1, 1, 8], strides = [1, 1, 1]} : vector<2x32x8xf32> to vector<1x1x8xf32>
    %152 = vector.shape_cast %151 : vector<1x1x8xf32> to vector<1x8xf32>
    %153 = vector.extract_strided_slice %106 {offsets = [0, 23, 0], sizes = [1, 1, 8], strides = [1, 1, 1]} : vector<2x32x8xf32> to vector<1x1x8xf32>
    %154 = vector.shape_cast %153 : vector<1x1x8xf32> to vector<1x8xf32>
    %155 = vector.extract_strided_slice %106 {offsets = [0, 24, 0], sizes = [1, 1, 8], strides = [1, 1, 1]} : vector<2x32x8xf32> to vector<1x1x8xf32>
    %156 = vector.shape_cast %155 : vector<1x1x8xf32> to vector<1x8xf32>
    %157 = vector.extract_strided_slice %106 {offsets = [0, 25, 0], sizes = [1, 1, 8], strides = [1, 1, 1]} : vector<2x32x8xf32> to vector<1x1x8xf32>
    %158 = vector.shape_cast %157 : vector<1x1x8xf32> to vector<1x8xf32>
    %159 = vector.extract_strided_slice %106 {offsets = [0, 26, 0], sizes = [1, 1, 8], strides = [1, 1, 1]} : vector<2x32x8xf32> to vector<1x1x8xf32>
    %160 = vector.shape_cast %159 : vector<1x1x8xf32> to vector<1x8xf32>
    %161 = vector.extract_strided_slice %106 {offsets = [0, 27, 0], sizes = [1, 1, 8], strides = [1, 1, 1]} : vector<2x32x8xf32> to vector<1x1x8xf32>
    %162 = vector.shape_cast %161 : vector<1x1x8xf32> to vector<1x8xf32>
    %163 = vector.extract_strided_slice %106 {offsets = [0, 28, 0], sizes = [1, 1, 8], strides = [1, 1, 1]} : vector<2x32x8xf32> to vector<1x1x8xf32>
    %164 = vector.shape_cast %163 : vector<1x1x8xf32> to vector<1x8xf32>
    %165 = vector.extract_strided_slice %106 {offsets = [0, 29, 0], sizes = [1, 1, 8], strides = [1, 1, 1]} : vector<2x32x8xf32> to vector<1x1x8xf32>
    %166 = vector.shape_cast %165 : vector<1x1x8xf32> to vector<1x8xf32>
    %167 = vector.extract_strided_slice %106 {offsets = [0, 30, 0], sizes = [1, 1, 8], strides = [1, 1, 1]} : vector<2x32x8xf32> to vector<1x1x8xf32>
    %168 = vector.shape_cast %167 : vector<1x1x8xf32> to vector<1x8xf32>
    %169 = vector.extract_strided_slice %106 {offsets = [0, 31, 0], sizes = [1, 1, 8], strides = [1, 1, 1]} : vector<2x32x8xf32> to vector<1x1x8xf32>
    %170 = vector.shape_cast %169 : vector<1x1x8xf32> to vector<1x8xf32>
    %171 = tpu.concatenate %108, %110, %112, %114, %116, %118, %120, %122, %124, %126, %128, %130, %132, %134, %136, %138 in 1 : vector<1x8xf32>, vector<1x8xf32>, vector<1x8xf32>, vector<1x8xf32>, vector<1x8xf32>, vector<1x8xf32>, vector<1x8xf32>, vector<1x8xf32>, vector<1x8xf32>, vector<1x8xf32>, vector<1x8xf32>, vector<1x8xf32>, vector<1x8xf32>, vector<1x8xf32>, vector<1x8xf32>, vector<1x8xf32> -> vector<1x128xf32>
    %172 = tpu.concatenate %140, %142, %144, %146, %148, %150, %152, %154, %156, %158, %160, %162, %164, %166, %168, %170 in 1 : vector<1x8xf32>, vector<1x8xf32>, vector<1x8xf32>, vector<1x8xf32>, vector<1x8xf32>, vector<1x8xf32>, vector<1x8xf32>, vector<1x8xf32>, vector<1x8xf32>, vector<1x8xf32>, vector<1x8xf32>, vector<1x8xf32>, vector<1x8xf32>, vector<1x8xf32>, vector<1x8xf32>, vector<1x8xf32> -> vector<1x128xf32>
    %173 = tpu.concatenate %171, %172 in 1 : vector<1x128xf32>, vector<1x128xf32> -> vector<1x256xf32>
    %174 = vector.extract_strided_slice %106 {offsets = [1, 0, 0], sizes = [1, 1, 8], strides = [1, 1, 1]} : vector<2x32x8xf32> to vector<1x1x8xf32>
    %175 = vector.shape_cast %174 : vector<1x1x8xf32> to vector<1x8xf32>
    %176 = vector.extract_strided_slice %106 {offsets = [1, 1, 0], sizes = [1, 1, 8], strides = [1, 1, 1]} : vector<2x32x8xf32> to vector<1x1x8xf32>
    %177 = vector.shape_cast %176 : vector<1x1x8xf32> to vector<1x8xf32>
    %178 = vector.extract_strided_slice %106 {offsets = [1, 2, 0], sizes = [1, 1, 8], strides = [1, 1, 1]} : vector<2x32x8xf32> to vector<1x1x8xf32>
    %179 = vector.shape_cast %178 : vector<1x1x8xf32> to vector<1x8xf32>
    %180 = vector.extract_strided_slice %106 {offsets = [1, 3, 0], sizes = [1, 1, 8], strides = [1, 1, 1]} : vector<2x32x8xf32> to vector<1x1x8xf32>
    %181 = vector.shape_cast %180 : vector<1x1x8xf32> to vector<1x8xf32>
    %182 = vector.extract_strided_slice %106 {offsets = [1, 4, 0], sizes = [1, 1, 8], strides = [1, 1, 1]} : vector<2x32x8xf32> to vector<1x1x8xf32>
    %183 = vector.shape_cast %182 : vector<1x1x8xf32> to vector<1x8xf32>
    %184 = vector.extract_strided_slice %106 {offsets = [1, 5, 0], sizes = [1, 1, 8], strides = [1, 1, 1]} : vector<2x32x8xf32> to vector<1x1x8xf32>
    %185 = vector.shape_cast %184 : vector<1x1x8xf32> to vector<1x8xf32>
    %186 = vector.extract_strided_slice %106 {offsets = [1, 6, 0], sizes = [1, 1, 8], strides = [1, 1, 1]} : vector<2x32x8xf32> to vector<1x1x8xf32>
    %187 = vector.shape_cast %186 : vector<1x1x8xf32> to vector<1x8xf32>
    %188 = vector.extract_strided_slice %106 {offsets = [1, 7, 0], sizes = [1, 1, 8], strides = [1, 1, 1]} : vector<2x32x8xf32> to vector<1x1x8xf32>
    %189 = vector.shape_cast %188 : vector<1x1x8xf32> to vector<1x8xf32>
    %190 = vector.extract_strided_slice %106 {offsets = [1, 8, 0], sizes = [1, 1, 8], strides = [1, 1, 1]} : vector<2x32x8xf32> to vector<1x1x8xf32>
    %191 = vector.shape_cast %190 : vector<1x1x8xf32> to vector<1x8xf32>
    %192 = vector.extract_strided_slice %106 {offsets = [1, 9, 0], sizes = [1, 1, 8], strides = [1, 1, 1]} : vector<2x32x8xf32> to vector<1x1x8xf32>
    %193 = vector.shape_cast %192 : vector<1x1x8xf32> to vector<1x8xf32>
    %194 = vector.extract_strided_slice %106 {offsets = [1, 10, 0], sizes = [1, 1, 8], strides = [1, 1, 1]} : vector<2x32x8xf32> to vector<1x1x8xf32>
    %195 = vector.shape_cast %194 : vector<1x1x8xf32> to vector<1x8xf32>
    %196 = vector.extract_strided_slice %106 {offsets = [1, 11, 0], sizes = [1, 1, 8], strides = [1, 1, 1]} : vector<2x32x8xf32> to vector<1x1x8xf32>
    %197 = vector.shape_cast %196 : vector<1x1x8xf32> to vector<1x8xf32>
    %198 = vector.extract_strided_slice %106 {offsets = [1, 12, 0], sizes = [1, 1, 8], strides = [1, 1, 1]} : vector<2x32x8xf32> to vector<1x1x8xf32>
    %199 = vector.shape_cast %198 : vector<1x1x8xf32> to vector<1x8xf32>
    %200 = vector.extract_strided_slice %106 {offsets = [1, 13, 0], sizes = [1, 1, 8], strides = [1, 1, 1]} : vector<2x32x8xf32> to vector<1x1x8xf32>
    %201 = vector.shape_cast %200 : vector<1x1x8xf32> to vector<1x8xf32>
    %202 = vector.extract_strided_slice %106 {offsets = [1, 14, 0], sizes = [1, 1, 8], strides = [1, 1, 1]} : vector<2x32x8xf32> to vector<1x1x8xf32>
    %203 = vector.shape_cast %202 : vector<1x1x8xf32> to vector<1x8xf32>
    %204 = vector.extract_strided_slice %106 {offsets = [1, 15, 0], sizes = [1, 1, 8], strides = [1, 1, 1]} : vector<2x32x8xf32> to vector<1x1x8xf32>
    %205 = vector.shape_cast %204 : vector<1x1x8xf32> to vector<1x8xf32>
    %206 = vector.extract_strided_slice %106 {offsets = [1, 16, 0], sizes = [1, 1, 8], strides = [1, 1, 1]} : vector<2x32x8xf32> to vector<1x1x8xf32>
    %207 = vector.shape_cast %206 : vector<1x1x8xf32> to vector<1x8xf32>
    %208 = vector.extract_strided_slice %106 {offsets = [1, 17, 0], sizes = [1, 1, 8], strides = [1, 1, 1]} : vector<2x32x8xf32> to vector<1x1x8xf32>
    %209 = vector.shape_cast %208 : vector<1x1x8xf32> to vector<1x8xf32>
    %210 = vector.extract_strided_slice %106 {offsets = [1, 18, 0], sizes = [1, 1, 8], strides = [1, 1, 1]} : vector<2x32x8xf32> to vector<1x1x8xf32>
    %211 = vector.shape_cast %210 : vector<1x1x8xf32> to vector<1x8xf32>
    %212 = vector.extract_strided_slice %106 {offsets = [1, 19, 0], sizes = [1, 1, 8], strides = [1, 1, 1]} : vector<2x32x8xf32> to vector<1x1x8xf32>
    %213 = vector.shape_cast %212 : vector<1x1x8xf32> to vector<1x8xf32>
    %214 = vector.extract_strided_slice %106 {offsets = [1, 20, 0], sizes = [1, 1, 8], strides = [1, 1, 1]} : vector<2x32x8xf32> to vector<1x1x8xf32>
    %215 = vector.shape_cast %214 : vector<1x1x8xf32> to vector<1x8xf32>
    %216 = vector.extract_strided_slice %106 {offsets = [1, 21, 0], sizes = [1, 1, 8], strides = [1, 1, 1]} : vector<2x32x8xf32> to vector<1x1x8xf32>
    %217 = vector.shape_cast %216 : vector<1x1x8xf32> to vector<1x8xf32>
    %218 = vector.extract_strided_slice %106 {offsets = [1, 22, 0], sizes = [1, 1, 8], strides = [1, 1, 1]} : vector<2x32x8xf32> to vector<1x1x8xf32>
    %219 = vector.shape_cast %218 : vector<1x1x8xf32> to vector<1x8xf32>
    %220 = vector.extract_strided_slice %106 {offsets = [1, 23, 0], sizes = [1, 1, 8], strides = [1, 1, 1]} : vector<2x32x8xf32> to vector<1x1x8xf32>
    %221 = vector.shape_cast %220 : vector<1x1x8xf32> to vector<1x8xf32>
    %222 = vector.extract_strided_slice %106 {offsets = [1, 24, 0], sizes = [1, 1, 8], strides = [1, 1, 1]} : vector<2x32x8xf32> to vector<1x1x8xf32>
    %223 = vector.shape_cast %222 : vector<1x1x8xf32> to vector<1x8xf32>
    %224 = vector.extract_strided_slice %106 {offsets = [1, 25, 0], sizes = [1, 1, 8], strides = [1, 1, 1]} : vector<2x32x8xf32> to vector<1x1x8xf32>
    %225 = vector.shape_cast %224 : vector<1x1x8xf32> to vector<1x8xf32>
    %226 = vector.extract_strided_slice %106 {offsets = [1, 26, 0], sizes = [1, 1, 8], strides = [1, 1, 1]} : vector<2x32x8xf32> to vector<1x1x8xf32>
    %227 = vector.shape_cast %226 : vector<1x1x8xf32> to vector<1x8xf32>
    %228 = vector.extract_strided_slice %106 {offsets = [1, 27, 0], sizes = [1, 1, 8], strides = [1, 1, 1]} : vector<2x32x8xf32> to vector<1x1x8xf32>
    %229 = vector.shape_cast %228 : vector<1x1x8xf32> to vector<1x8xf32>
    %230 = vector.extract_strided_slice %106 {offsets = [1, 28, 0], sizes = [1, 1, 8], strides = [1, 1, 1]} : vector<2x32x8xf32> to vector<1x1x8xf32>
    %231 = vector.shape_cast %230 : vector<1x1x8xf32> to vector<1x8xf32>
    %232 = vector.extract_strided_slice %106 {offsets = [1, 29, 0], sizes = [1, 1, 8], strides = [1, 1, 1]} : vector<2x32x8xf32> to vector<1x1x8xf32>
    %233 = vector.shape_cast %232 : vector<1x1x8xf32> to vector<1x8xf32>
    %234 = vector.extract_strided_slice %106 {offsets = [1, 30, 0], sizes = [1, 1, 8], strides = [1, 1, 1]} : vector<2x32x8xf32> to vector<1x1x8xf32>
    %235 = vector.shape_cast %234 : vector<1x1x8xf32> to vector<1x8xf32>
    %236 = vector.extract_strided_slice %106 {offsets = [1, 31, 0], sizes = [1, 1, 8], strides = [1, 1, 1]} : vector<2x32x8xf32> to vector<1x1x8xf32>
    %237 = vector.shape_cast %236 : vector<1x1x8xf32> to vector<1x8xf32>
    %238 = tpu.concatenate %175, %177, %179, %181, %183, %185, %187, %189, %191, %193, %195, %197, %199, %201, %203, %205 in 1 : vector<1x8xf32>, vector<1x8xf32>, vector<1x8xf32>, vector<1x8xf32>, vector<1x8xf32>, vector<1x8xf32>, vector<1x8xf32>, vector<1x8xf32>, vector<1x8xf32>, vector<1x8xf32>, vector<1x8xf32>, vector<1x8xf32>, vector<1x8xf32>, vector<1x8xf32>, vector<1x8xf32>, vector<1x8xf32> -> vector<1x128xf32>
    %239 = tpu.concatenate %207, %209, %211, %213, %215, %217, %219, %221, %223, %225, %227, %229, %231, %233, %235, %237 in 1 : vector<1x8xf32>, vector<1x8xf32>, vector<1x8xf32>, vector<1x8xf32>, vector<1x8xf32>, vector<1x8xf32>, vector<1x8xf32>, vector<1x8xf32>, vector<1x8xf32>, vector<1x8xf32>, vector<1x8xf32>, vector<1x8xf32>, vector<1x8xf32>, vector<1x8xf32>, vector<1x8xf32>, vector<1x8xf32> -> vector<1x128xf32>
    %240 = tpu.concatenate %238, %239 in 1 : vector<1x128xf32>, vector<1x128xf32> -> vector<1x256xf32>
    %241 = tpu.concatenate %173, %240 in 0 : vector<1x256xf32>, vector<1x256xf32> -> vector<2x256xf32>
    %c0_22 = arith.constant 0 : index
    %c0_23 = arith.constant 0 : index
    %242 = vector.load %arg4[%c0_22, %c0_23] : memref<2x256xf32, #tpu.memory_space<vmem>>, vector<2x256xf32>
    tpu.vector_store %arg4[%c0_22, %c0_23], %105 {strides = array<i32>} : memref<2x256xf32, #tpu.memory_space<vmem>>, vector<2x256xf32>,
    %c0_24 = arith.constant 0 : index
    %c0_25 = arith.constant 0 : index
    %243 = vector.load %arg5[%c0_24, %c0_25] : memref<2x256xf32, #tpu.memory_space<vmem>>, vector<2x256xf32>
    tpu.vector_store %arg5[%c0_24, %c0_25], %241 {strides = array<i32>} : memref<2x256xf32, #tpu.memory_space<vmem>>, vector<2x256xf32>,
    return
  }
  func.func @transform_0(%arg0: i32) -> (i32, i32) {
    %c0_i32 = arith.constant 0 : i32
    %c0_i32_0 = arith.constant 0 : i32
    %c0_i32_1 = arith.constant 0 : i32
    return %c0_i32, %c0_i32_0 : i32, i32
  }
  func.func @transform_1(%arg0: i32) -> (i32, i32) {
    %c0_i32 = arith.constant 0 : i32
    %c0_i32_0 = arith.constant 0 : i32
    %c0_i32_1 = arith.constant 0 : i32
    return %c0_i32, %c0_i32_0 : i32, i32
  }
  func.func @transform_2(%arg0: i32) -> (i32, i32) {
    %c0_i32 = arith.constant 0 : i32
    %c0_i32_0 = arith.constant 0 : i32
    %c0_i32_1 = arith.constant 0 : i32
    return %c0_i32, %c0_i32_0 : i32, i32
  }
  func.func @transform_3(%arg0: i32) -> (i32, i32) {
    %c0_i32 = arith.constant 0 : i32
    %c0_i32_0 = arith.constant 0 : i32
    %c0_i32_1 = arith.constant 0 : i32
    return %c0_i32, %c0_i32_0 : i32, i32
  }
  func.func @transform_4(%arg0: i32) -> (i32, i32) {
    %c0_i32 = arith.constant 0 : i32
    %c0_i32_0 = arith.constant 0 : i32
    %c0_i32_1 = arith.constant 0 : i32
    return %c0_i32, %c0_i32_0 : i32, i32
  }
}

</mosaic_0001>

<bundles_post_ra>
// kernel: tpu_custom_call.1
= control target key start
LH: loop header
LB: loop body
LE: loop exit
PB: predicated region body
PF: predicated region fallthrough
CT: control target
= control target key end

     0   :  { %10 = vsyncpa [#allocation3], 0  ;;  %s2808_s0 = inlined_call_operand.hbm [shape: f32[16,16], index: 0, kind: input, shape index: {}]   ;;  %s2809_s1 = inlined_call_operand.hbm [shape: f32[16,96], index: 1, kind: input, shape index: {}]   ;;  %s2810_s2 = inlined_call_operand.vmem [shape: f32[1,96], index: 2, kind: input, shape index: {}]   ;;  %s2811_s3 = inlined_call_operand.hbm [shape: f32[2,256], index: 3, kind: output, shape index: {0}]   ;;  %s2812_s4 = inlined_call_operand.hbm [shape: f32[2,256], index: 4, kind: output, shape index: {1}]  }
   0x1   :  { %11 = vsyncpa [#allocation6], 0 }
   0x2   :  { %12 = vsyncpa [#allocation4], 0 }
   0x3   :  { %13 = vsyncpa [#allocation9], 0  ;;  %s2232_s15 = smov [#allocation2]  }
   0x4   :  { %s19_s16 = sshll.u32 %s2232_s15, 4  ;;  %s20_s16 = int_to_ptr.vmem [resolvable:$true] %s19_s16 }
   0x5   :  { %s2152_s17 = scalar_lea.vmem %s20_s16, 256  ;;  %p2157_p1 = scmp.lt.s32.totalorder %s20_s16, %s20_s16 }
   0x6   :  { %p2153_p0 = scmp.ne.s32.totalorder %s20_s16, %s2152_s17  ;;  %p2158_p2 = scmp.lt.s32.totalorder %s2152_s17, %s2152_s17 }
   0x8   :  { %p2159_p3 = por %p2158_p2, %p2157_p1 }
   0xa   :  { %p2160_p4 = pnand %p2159_p3, %p2153_p0 }
   0xc   :  { %2163 = shalt.err (!%p2160_p4)
}
   0xd   :  { %s2233_s18 = smov 128   ;;  %s2234_s19 = smov 8  }
   0xe   :  { %25 = dma.hbm_to_vmem [thread:$0]  %s2808_s0, 256, %s20_s16, [#allocation3], %s2233_s18, %s2233_s18, %s2234_s19  }
   0xf   :  { %s2235_s22 = smov [#allocation5]  }
  0x10   :  { %s31_s23 = sshll.u32 %s2235_s22, 4  ;;  %s32_s23 = int_to_ptr.vmem [resolvable:$true] %s31_s23 }
  0x11   :  { %s2172_s24 = scalar_lea.vmem %s32_s23, 256  ;;  %p2177_p6 = scmp.lt.s32.totalorder %s32_s23, %s32_s23 }
  0x12   :  { %p2173_p5 = scmp.ne.s32.totalorder %s32_s23, %s2172_s24  ;;  %p2178_p7 = scmp.lt.s32.totalorder %s2172_s24, %s2172_s24 }
  0x14   :  { %p2179_p8 = por %p2178_p7, %p2177_p6 }
  0x16   :  { %p2180_p9 = pnand %p2179_p8, %p2173_p5 }
  0x18   :  { %2183 = shalt.err (!%p2180_p9)
}
  0x19   :  { %37 = dma.hbm_to_vmem [thread:$0]  %s2809_s1, 256, %s32_s23, [#allocation6], %s2233_s18, %s2233_s18, %s2234_s19  }
  0x1a   :  { %2224 = dma.done.wait [#allocation3], 256  }
  0x1b   :  { %2225 = vsyncadd [#allocation3], 4294967040 }
  0x1c   :  { %2226 = dma.done.wait [#allocation6], 256  }
  0x1d   :  { %2227 = vsyncadd [#allocation6], 4294967040  ;;  %vm57_vm0 = vcmask 130048   ;;  %v49_v0 = vld [vmem:[#allocation5 + $0x8] sm:$0xff]  ;;  %v48_v1 = vld [vmem:[#allocation5] sm:$0xff]  ;;  %v2236_v4 = vmov 0.0  }
  0x1e   :  { %v46_v2 = vld [vmem:[#allocation2] sm:$0xff]  ;;  %2003 = vmatprep.subr.mxu0 %v49_v0  ;;  %v47_v3 = vld [vmem:[#allocation2 + $0x8] sm:$0xff]  ;;  %2010 = vmatprep.subr.mxu1 %v2236_v4  ;;  %vm2237_vm1 = vmmov 0   ;;  %s2238_s27 = smov 96   ;;  %vm144_vm2 = vcmask 64512   ;;  %s2240_s28 = smov 88  }
  0x1f   :  { %2007 = vmatprep.mubr.msk.f32.mxu0 %vm57_vm0, %v46_v2  ;;  %2004 = vmatpush3.msra.mxu0 %v49_v0  ;;  %v1938_v5 = vld [vmem:[%s2810_s2] ss:$0 sm:$0xff]  ;;  %s2239_s2 = smov 64   ;;  %s2241_s29 = smov 120   ;;  %vm1490_vm3 = vcmask 195584   ;;  %vm1520_vm4 = vcmask 261120  }
  0x20   :  { %2005 = vmatprep.subr.mxu0 %v48_v1  ;;  %2012 = vmatprep.mubr.msk.f32.mxu1 %vm2237_vm1, %v2236_v4  ;;  %s2242_s30 = smov 56   ;;  %s2243_s5 = smov 80   ;;  %vm1634_vm5 = vcmask 326656   ;;  %vm1636_vm6 = vcmask 392192   ;;  %vm1638_vm7 = vcmask 457728   ;;  %vm1522_vm8 = vcmask 523264  }
  0x21   :  { %2006 = vmatpush3.msra.mxu0 %v48_v1  ;;  %s2244_s6 = smov 112   ;;  %s2245_s7 = smov 48   ;;  %vm1641_vm9 = vcmask 588800   ;;  %vm1643_vm10 = vcmask 654336   ;;  %vm1645_vm11 = vcmask 719872   ;;  %vm1524_vm12 = vcmask 785408  }
  0x22   :  { %2008 = vmatmul.mubr.msk.f32.vlgmr.msra.gmra.mxu0 %vm57_vm0, %v47_v3  ;;  %2015 = vmatprep.subr.mxu0 %v2236_v4  ;;  %s2246_s8 = smov 72   ;;  %s2247_s9 = smov 104   ;;  %vm1648_vm13 = vcmask 850944   ;;  %vm1650_vm14 = vcmask 916480   ;;  %vm1652_vm15 = vcmask 982016  }
  0x23   :  { %2017 = vmatprep.mubr.msk.f32.mxu0 %vm2237_vm1, %v2236_v4  ;;  %s2248_s10 = smov 40   ;;  %s2249_s11 = smov 16  }
  0x24   :  { %s2250_s12 = smov 32   ;;  %s2251_s13 = smov 24  }
  0x25   :  { %s2252_s14 = smov [#allocation7]   ;;  %s2253_s16 = smov [#allocation8]  }
  0x26   :  { %s1914_s15 = sshll.u32 %s2252_s14, 4  ;;  %s1924_s17 = sshll.u32 %s2253_s16, 4  ;;  %s1915_s15 = int_to_ptr.vmem [resolvable:$true] %s1914_s15  ;;  %s1925_s17 = int_to_ptr.vmem [resolvable:$true] %s1924_s17 }
  0x27   :  { %s2184_s18 = scalar_lea.vmem %s1915_s15, 64  ;;  %p2189_p11 = scmp.lt.s32.totalorder %s1915_s15, %s1915_s15 }
  0x28   :  { %p2185_p10 = scmp.ne.s32.totalorder %s1915_s15, %s2184_s18  ;;  %p2190_p12 = scmp.lt.s32.totalorder %s2184_s18, %s2184_s18 }
  0x2a   :  { %p2191_p13 = por %p2190_p12, %p2189_p11 }
  0x2c   :  { %p2192_p0 = pnand %p2191_p13, %p2185_p10 }
  0xe2   :  { %v2009_v6 = vpop.f32.mrf.mxu0 }
  0xe3   :  { %v2298_v7 = vadd.f32 %v2009_v6, %v1938_v5 }
  0xe4   :  { %v130_v8 = vpop.f32.mrf.mxu0 }
  0xe5   :  { %221 = vrot.lane.b32.xlu0 %v2298_v7, %s2238_s27  ;;  %v2302_v9 = vadd.f32 %v1938_v5, %v130_v8  ;;  %v2308_v11 = vmul.f32 0.35355338, %v2298_v7 }
  0xe7   :  { %v2317_v13 = vmul.f32 0.35355338, %v2302_v9 }
  0xe9   :  { %142 = vrot.lane.b32.xlu0 %v2302_v9, %s2238_s27 }
 0x157   :  { %v222_v10 = vpop.permute.xlu0 %221 }
 0x158   :  { %2016 = vmatpush3.xpose.msk.msra.mxu0 %vm144_vm2, %v222_v10 }
 0x159   :  { %2025 = vmatprep.subr.mxu0 %v2236_v4 }
 0x15b   :  { %2018 = vmatmul.mubr.msk.f32.vlgmr.msra.gmra.mxu0 %vm144_vm2, %v2308_v11  ;;  %v143_v12 = vpop.permute.xlu0 %142 }
 0x15c   :  { %2011 = vmatpush3.xpose.msk.msra.mxu1 %vm144_vm2, %v143_v12  ;;  %2027 = vmatprep.mubr.msk.f32.mxu0 %vm2237_vm1, %v2236_v4 }
 0x15d   :  { %2020 = vmatprep.subr.mxu1 %v2236_v4 }
 0x15f   :  { %2013 = vmatmul.mubr.msk.f32.vlgmr.msra.gmra.mxu1 %vm144_vm2, %v2317_v13 }
 0x160   :  { %2022 = vmatprep.mubr.msk.f32.mxu1 %vm2237_vm1, %v2236_v4 }
 0x21b   :  { %v294_v14 = vpop.f32.mrf.mxu0 }
 0x21c   :  { %v301_v15 = vsel %vm144_vm2, %v294_v14, -inf }
 0x21d   :  { %302 = vmax.xlane.f32.xlu1 %v301_v15  ;;  %v2019_v16 = vpop.f32.mrf.mxu0 }
 0x21f   :  { %v216_v17 = vpop.f32.mrf.mxu1 }
 0x220   :  { %v298_v18 = vsel %vm144_vm2, %v216_v17, -inf }
 0x221   :  { %299 = vmax.xlane.f32.xlu1 %v298_v18  ;;  %v2014_v19 = vpop.f32.mrf.mxu1 }
 0x232   :  { %396 = vrot.lane.b32.xlu1 %v2298_v7, %s2239_s2 }
 0x236   :  { %320 = vrot.lane.b32.xlu1 %v2302_v9, %s2239_s2 }
 0x23a   :  { %552 = vrot.lane.b32.xlu1 %v2298_v7, %s2240_s28 }
 0x23e   :  { %474 = vrot.lane.b32.xlu1 %v2302_v9, %s2240_s28 }
 0x2a6   :  { %v303_v20 = vpop.xlane.xlu1 %302 }
 0x2a7   :  { %v305_v21 = vsub.f32 %v294_v14, %v303_v20 }
 0x2a9   :  { %v308_v22 = vmul.f32 1.442695, %v305_v21 }
 0x2aa   :  { %v300_v23 = vpop.xlane.xlu1 %299 }
 0x2ab   :  { %2112 = vpow2.f32 %v308_v22  ;;  %v304_v24 = vsub.f32 %v216_v17, %v300_v23 }
 0x2ad   :  { %v306_v25 = vmul.f32 1.442695, %v304_v24 }
 0x2ae   :  { %v397_v26 = vpop.permute.xlu1 %396 }
 0x2af   :  { %2114 = vpow2.f32 %v306_v25  ;;  %2026 = vmatpush3.msra.mxu0 %v397_v26 }
 0x2b0   :  { %2035 = vmatprep.subr.mxu0 %v2236_v4 }
 0x2b2   :  { %v321_v27 = vpop.permute.xlu1 %320 }
 0x2b3   :  { %2021 = vmatpush3.msra.mxu1 %v321_v27 }
 0x2b4   :  { %2030 = vmatprep.subr.mxu1 %v2236_v4 }
 0x2b6   :  { %v553_v32 = vpop.permute.xlu1 %552 }
 0x2b8   :  { %v2113_v28 = vpop.eup %2112 }
 0x2b9   :  { %v313_v29 = vsel %vm144_vm2, %v2113_v28, 0.0 }
 0x2ba   :  { %314 = vadd.xlane.f32.xlu0 %v313_v29  ;;  %v475_v33 = vpop.permute.xlu1 %474 }
 0x2bc   :  { %v2115_v30 = vpop.eup %2114 }
 0x2bd   :  { %v310_v31 = vsel %vm144_vm2, %v2115_v30, 0.0 }
 0x2be   :  { %311 = vadd.xlane.f32.xlu1 %v310_v31 }
 0x2cf   :  { %472 = vrot.lane.b32.xlu1 %v2317_v13, %s2241_s29 }
 0x2d0   :  { %550 = vrot.lane.b32.xlu0 %v2308_v11, %s2241_s29 }
 0x343   :  { %v315_v34 = vpop.xlane.xlu0 %314 }
 0x344   :  { %2116 = vrcp.f32 %v315_v34 }
 0x347   :  { %v312_v35 = vpop.xlane.xlu1 %311  ;;  %v551_v40 = vpop.permute.xlu0 %550 }
 0x348   :  { %2118 = vrcp.f32 %v312_v35 }
 0x34b   :  { %v473_v41 = vpop.permute.xlu1 %472 }
 0x351   :  { %v2117_v36 = vpop.eup %2116 }
 0x352   :  { %v2342_v37 = vmul.f32 %v2117_v36, %v2113_v28 }
 0x354   :  { %2028 = vmatmul.mubr.msk.f32.vlgmr.msra.gmra.mxu0 %vm144_vm2, %v2342_v37 }
 0x355   :  { %v2119_v38 = vpop.eup %2118  ;;  %2036 = vmatpush3.xpose.msk.msra.mxu0 %vm144_vm2, %v553_v32  ;;  %2037 = vmatprep.mubr.msk.f32.mxu0 %vm2237_vm1, %v2236_v4 }
 0x356   :  { %v2349_v39 = vmul.f32 %v2119_v38, %v2115_v30  ;;  %2045 = vmatprep.subr.mxu0 %v2236_v4 }
 0x358   :  { %2023 = vmatmul.mubr.msk.f32.vlgmr.msra.gmra.mxu1 %vm144_vm2, %v2349_v39  ;;  %2038 = vmatmul.mubr.msk.f32.vlgmr.msra.gmra.mxu0 %vm144_vm2, %v551_v40 }
 0x359   :  { %2031 = vmatpush3.xpose.msk.msra.mxu1 %vm144_vm2, %v475_v33  ;;  %2032 = vmatprep.mubr.msk.f32.mxu1 %vm2237_vm1, %v2236_v4 }
 0x35a   :  { %2040 = vmatprep.subr.mxu1 %v2236_v4  ;;  %2047 = vmatprep.mubr.msk.f32.mxu0 %vm2237_vm1, %v2236_v4 }
 0x35c   :  { %2033 = vmatmul.mubr.msk.f32.vlgmr.msra.gmra.mxu1 %vm144_vm2, %v473_v41 }
 0x35d   :  { %2042 = vmatprep.mubr.msk.f32.mxu1 %vm2237_vm1, %v2236_v4 }
 0x414   :  { %v2364_v42 = vpop.f32.mrf.mxu0 }
 0x416   :  { %v2029_v43 = vpop.f32.mrf.mxu0 }
 0x418   :  { %v2366_v44 = vpop.f32.mrf.mxu1  ;;  %v624_v45 = vpop.f32.mrf.mxu0 }
 0x419   :  { %v631_v46 = vsel %vm144_vm2, %v624_v45, -inf }
 0x41a   :  { %632 = vmax.xlane.f32.xlu1 %v631_v46  ;;  %v2024_v47 = vpop.f32.mrf.mxu1  ;;  %v2039_v48 = vpop.f32.mrf.mxu0 }
 0x41c   :  { %v546_v49 = vpop.f32.mrf.mxu1 }
 0x41d   :  { %v628_v50 = vsel %vm144_vm2, %v546_v49, -inf }
 0x41e   :  { %629 = vmax.xlane.f32.xlu0 %v628_v50  ;;  %v2034_v51 = vpop.f32.mrf.mxu1 }
 0x42b   :  { %726 = vrot.lane.b32.xlu1 %v2298_v7, %s2242_s30 }
 0x42f   :  { %882 = vrot.lane.b32.xlu1 %v2298_v7, %s2243_s5 }
 0x433   :  { %804 = vrot.lane.b32.xlu1 %v2302_v9, %s2243_s5 }
 0x434   :  { %650 = vrot.lane.b32.xlu0 %v2302_v9, %s2242_s30 }
 0x438   :  { %880 = vrot.lane.b32.xlu0 %v2308_v11, %s2244_s6 }
 0x4a3   :  { %v633_v52 = vpop.xlane.xlu1 %632 }
 0x4a4   :  { %v635_v53 = vsub.f32 %v624_v45, %v633_v52 }
 0x4a6   :  { %v638_v54 = vmul.f32 1.442695, %v635_v53 }
 0x4a7   :  { %v727_v55 = vpop.permute.xlu1 %726  ;;  %v630_v56 = vpop.xlane.xlu0 %629 }
 0x4a8   :  { %2120 = vpow2.f32 %v638_v54  ;;  %v634_v57 = vsub.f32 %v546_v49, %v630_v56  ;;  %2046 = vmatpush3.msra.mxu0 %v727_v55 }
 0x4a9   :  { %2055 = vmatprep.subr.mxu0 %v2236_v4 }
 0x4aa   :  { %v636_v58 = vmul.f32 1.442695, %v634_v57 }
 0x4ab   :  { %v651_v59 = vpop.permute.xlu0 %650  ;;  %v883_v0 = vpop.permute.xlu1 %882 }
 0x4ac   :  { %2122 = vpow2.f32 %v636_v58  ;;  %2041 = vmatpush3.msra.mxu1 %v651_v59  ;;  %v1583_v59 = vrot.slane %v2349_v39, 4 }
 0x4ad   :  { %2050 = vmatprep.subr.mxu1 %v2236_v4 }
 0x4af   :  { %v805_v1 = vpop.permute.xlu1 %804  ;;  %v881_v12 = vpop.permute.xlu0 %880 }
 0x4b5   :  { %v2121_v60 = vpop.eup %2120 }
 0x4b6   :  { %v643_v61 = vsel %vm144_vm2, %v2121_v60, 0.0 }
 0x4b7   :  { %644 = vadd.xlane.f32.xlu1 %v643_v61 }
 0x4b9   :  { %v2123_v62 = vpop.eup %2122 }
 0x4ba   :  { %v640_v63 = vsel %vm144_vm2, %v2123_v62, 0.0 }
 0x4bb   :  { %641 = vadd.xlane.f32.xlu1 %v640_v63 }
 0x4cc   :  { %802 = vrot.lane.b32.xlu1 %v2317_v13, %s2244_s6 }
 0x540   :  { %v645_v2 = vpop.xlane.xlu1 %644 }
 0x541   :  { %2124 = vrcp.f32 %v645_v2  ;;  %v1728_v2 = vrot.slane %v2342_v37, 1 }
 0x544   :  { %v642_v3 = vpop.xlane.xlu1 %641 }
 0x545   :  { %2126 = vrcp.f32 %v642_v3  ;;  %v1732_v3 = vrot.slane %v2342_v37, 2 }
 0x548   :  { %v803_v14 = vpop.permute.xlu1 %802 }
 0x54e   :  { %v2125_v5 = vpop.eup %2124 }
 0x54f   :  { %v2386_v6 = vmul.f32 %v2125_v5, %v2121_v60  ;;  %v1736_v5 = vrot.slane %v2342_v37, 3 }
 0x551   :  { %2048 = vmatmul.mubr.msk.f32.vlgmr.msra.gmra.mxu0 %vm144_vm2, %v2386_v6 }
 0x552   :  { %v2127_v8 = vpop.eup %2126  ;;  %2056 = vmatpush3.xpose.msk.msra.mxu0 %vm144_vm2, %v883_v0  ;;  %2057 = vmatprep.mubr.msk.f32.mxu0 %vm2237_vm1, %v2236_v4 }
 0x553   :  { %v2393_v10 = vmul.f32 %v2127_v8, %v2123_v62  ;;  %2065 = vmatprep.subr.mxu0 %v2236_v4  ;;  %v1740_v8 = vrot.slane %v2342_v37, 4 }
 0x555   :  { %2043 = vmatmul.mubr.msk.f32.vlgmr.msra.gmra.mxu1 %vm144_vm2, %v2393_v10  ;;  %2058 = vmatmul.mubr.msk.f32.vlgmr.msra.gmra.mxu0 %vm144_vm2, %v881_v12  ;;  %v1606_v60 = vrot.slane %v2393_v10, 2  ;;  %v1614_v61 = vrot.slane %v2393_v10, 4  ;;  %v1622_v62 = vrot.slane %v2393_v10, 6  ;;  %v1744_v12 = vrot.slane %v2342_v37, 5 }
 0x556   :  { %2051 = vmatpush3.xpose.msk.msra.mxu1 %vm144_vm2, %v805_v1  ;;  %2052 = vmatprep.mubr.msk.f32.mxu1 %vm2237_vm1, %v2236_v4 }
 0x557   :  { %2060 = vmatprep.subr.mxu1 %v2236_v4  ;;  %2067 = vmatprep.mubr.msk.f32.mxu0 %vm2237_vm1, %v2236_v4 }
 0x559   :  { %2053 = vmatmul.mubr.msk.f32.vlgmr.msra.gmra.mxu1 %vm144_vm2, %v803_v14  ;;  %v1748_v14 = vrot.slane %v2342_v37, 6 }
 0x55a   :  { %2062 = vmatprep.mubr.msk.f32.mxu1 %vm2237_vm1, %v2236_v4 }
 0x611   :  { %v2408_v15 = vpop.f32.mrf.mxu0 }
 0x613   :  { %v2049_v16 = vpop.f32.mrf.mxu0 }
 0x615   :  { %v2410_v17 = vpop.f32.mrf.mxu1  ;;  %v954_v18 = vpop.f32.mrf.mxu0 }
 0x616   :  { %v961_v19 = vsel %vm144_vm2, %v954_v18, -inf }
 0x617   :  { %962 = vmax.xlane.f32.xlu0 %v961_v19  ;;  %v2044_v20 = vpop.f32.mrf.mxu1  ;;  %v2059_v21 = vpop.f32.mrf.mxu0 }
 0x619   :  { %v876_v22 = vpop.f32.mrf.mxu1 }
 0x61a   :  { %v958_v23 = vsel %vm144_vm2, %v876_v22, -inf }
 0x61b   :  { %959 = vmax.xlane.f32.xlu1 %v958_v23  ;;  %v2054_v24 = vpop.f32.mrf.mxu1 }
 0x62c   :  { %1056 = vrot.lane.b32.xlu1 %v2298_v7, %s2245_s7 }
 0x62d   :  { %980 = vrot.lane.b32.xlu0 %v2302_v9, %s2245_s7 }
 0x630   :  { %1212 = vrot.lane.b32.xlu1 %v2298_v7, %s2246_s8 }
 0x634   :  { %1134 = vrot.lane.b32.xlu1 %v2302_v9, %s2246_s8 }
 0x638   :  { %1132 = vrot.lane.b32.xlu1 %v2317_v13, %s2247_s9 }
 0x6a0   :  { %v963_v25 = vpop.xlane.xlu0 %962 }
 0x6a1   :  { %v965_v26 = vsub.f32 %v954_v18, %v963_v25 }
 0x6a3   :  { %v968_v27 = vmul.f32 1.442695, %v965_v26 }
 0x6a4   :  { %v981_v28 = vpop.permute.xlu0 %980  ;;  %v960_v29 = vpop.xlane.xlu1 %959 }
 0x6a5   :  { %2128 = vpow2.f32 %v968_v27  ;;  %v964_v30 = vsub.f32 %v876_v22, %v960_v29  ;;  %2061 = vmatpush3.msra.mxu1 %v981_v28 }
 0x6a6   :  { %2070 = vmatprep.subr.mxu1 %v2236_v4 }
 0x6a7   :  { %v966_v31 = vmul.f32 1.442695, %v964_v30 }
 0x6a8   :  { %v1057_v32 = vpop.permute.xlu1 %1056 }
 0x6a9   :  { %2130 = vpow2.f32 %v966_v31  ;;  %2066 = vmatpush3.msra.mxu0 %v1057_v32 }
 0x6aa   :  { %2075 = vmatprep.subr.mxu0 %v2236_v4 }
 0x6ac   :  { %v1213_v40 = vpop.permute.xlu1 %1212 }
 0x6b0   :  { %v1135_v46 = vpop.permute.xlu1 %1134 }
 0x6b2   :  { %v2129_v33 = vpop.eup %2128 }
 0x6b3   :  { %v973_v34 = vsel %vm144_vm2, %v2129_v33, 0.0 }
 0x6b4   :  { %974 = vadd.xlane.f32.xlu0 %v973_v34  ;;  %v1133_v48 = vpop.permute.xlu1 %1132 }
 0x6b6   :  { %v2131_v13 = vpop.eup %2130 }
 0x6b7   :  { %v970_v35 = vsel %vm144_vm2, %v2131_v13, 0.0 }
 0x6b8   :  { %971 = vadd.xlane.f32.xlu0 %v970_v35 }
 0x6ce   :  { %1210 = vrot.lane.b32.xlu0 %v2308_v11, %s2247_s9 }
 0x73d   :  { %v975_v36 = vpop.xlane.xlu0 %974 }
 0x73e   :  { %2132 = vrcp.f32 %v975_v36 }
 0x741   :  { %v972_v38 = vpop.xlane.xlu0 %971 }
 0x742   :  { %2134 = vrcp.f32 %v972_v38 }
 0x745   :  { %v1211_v11 = vpop.permute.xlu0 %1210 }
 0x74b   :  { %v2133_v41 = vpop.eup %2132 }
 0x74c   :  { %v2430_v43 = vmul.f32 %v2133_v41, %v2129_v33  ;;  %v1571_v41 = vrot.slane %v2349_v39, 1 }
 0x74e   :  { %2068 = vmatmul.mubr.msk.f32.vlgmr.msra.gmra.mxu0 %vm144_vm2, %v2430_v43 }
 0x74f   :  { %v2135_v45 = vpop.eup %2134  ;;  %2076 = vmatpush3.xpose.msk.msra.mxu0 %vm144_vm2, %v1213_v40  ;;  %2077 = vmatprep.mubr.msk.f32.mxu0 %vm2237_vm1, %v2236_v4 }
 0x750   :  { %v2437_v47 = vmul.f32 %v2135_v45, %v2131_v13  ;;  %2085 = vmatprep.subr.mxu0 %v2236_v4 }
 0x752   :  { %2063 = vmatmul.mubr.msk.f32.vlgmr.msra.gmra.mxu1 %vm144_vm2, %v2437_v47  ;;  %2078 = vmatmul.mubr.msk.f32.vlgmr.msra.gmra.mxu0 %vm144_vm2, %v1211_v11  ;;  %v1654_v63 = vrot.slane %v2437_v47, 1  ;;  %v1662_v0 = vrot.slane %v2437_v47, 3  ;;  %v1670_v1 = vrot.slane %v2437_v47, 5  ;;  %v1678_v16 = vrot.slane %v2437_v47, 7 }
 0x753   :  { %2071 = vmatpush3.xpose.msk.msra.mxu1 %vm144_vm2, %v1135_v46  ;;  %2072 = vmatprep.mubr.msk.f32.mxu1 %vm2237_vm1, %v2236_v4  ;;  %v1579_v46 = vrot.slane %v2349_v39, 3 }
 0x754   :  { %2080 = vmatprep.subr.mxu1 %v2236_v4  ;;  %2087 = vmatprep.mubr.msk.f32.mxu0 %vm2237_vm1, %v2236_v4 }
 0x756   :  { %2073 = vmatmul.mubr.msk.f32.vlgmr.msra.gmra.mxu1 %vm144_vm2, %v1133_v48 }
 0x757   :  { %2082 = vmatprep.mubr.msk.f32.mxu1 %vm2237_vm1, %v2236_v4  ;;  %v1575_v4 = vrot.slane %v2349_v39, 2 }
 0x80e   :  { %v1128_v49 = vpop.f32.mrf.mxu0 }
 0x810   :  { %v2069_v50 = vpop.f32.mrf.mxu0 }
 0x812   :  { %v2452_v51 = vpop.f32.mrf.mxu1  ;;  %v1284_v52 = vpop.f32.mrf.mxu0 }
 0x813   :  { %v1291_v53 = vsel %vm144_vm2, %v1284_v52, -inf }
 0x814   :  { %1292 = vmax.xlane.f32.xlu0 %v1291_v53  ;;  %v2064_v54 = vpop.f32.mrf.mxu1  ;;  %v2079_v55 = vpop.f32.mrf.mxu0 }
 0x815   :  { %v1610_v55 = vrot.slane %v2393_v10, 3 }
 0x816   :  { %v1206_v56 = vpop.f32.mrf.mxu1 }
 0x817   :  { %v1288_v57 = vsel %vm144_vm2, %v1206_v56, -inf }
 0x818   :  { %1289 = vmax.xlane.f32.xlu1 %v1288_v57  ;;  %v2074_v58 = vpop.f32.mrf.mxu1 }
 0x819   :  { %v1618_v58 = vrot.slane %v2393_v10, 5 }
 0x829   :  { %1386 = vrot.lane.b32.xlu1 %v2298_v7, %s2248_s10  ;;  %v1591_v7 = vrot.slane %v2349_v39, 6 }
 0x82d   :  { %1464 = vrot.lane.b32.xlu1 %v2410_v17, %s2234_s19 }
 0x831   :  { %1466 = vrot.lane.b32.xlu1 %v2408_v15, %s2234_s19  ;;  %v1752_v15 = vrot.slane %v2342_v37, 7 }
 0x835   :  { %1474 = vrot.lane.b32.xlu1 %v1128_v49, %s2249_s11  ;;  %v1595_v49 = vrot.slane %v2349_v39, 7 }
 0x839   :  { %1576 = vrot.lane.b32.xlu1 %v1575_v4, %s2249_s11 }
 0x83d   :  { %1584 = vrot.lane.b32.xlu1 %v1583_v59, %s2250_s12  ;;  %v1626_v59 = vrot.slane %v2393_v10, 7 }
 0x841   :  { %1592 = vrot.lane.b32.xlu1 %v1591_v7, %s2245_s7 }
 0x845   :  { %1599 = vrot.lane.b32.xlu1 %v2393_v10, %s2239_s2 }
 0x849   :  { %1607 = vrot.lane.b32.xlu1 %v1606_v60, %s2243_s5 }
 0x84d   :  { %1615 = vrot.lane.b32.xlu1 %v1614_v61, %s2238_s27  ;;  %v1658_v61 = vrot.slane %v2437_v47, 2 }
 0x851   :  { %1623 = vrot.lane.b32.xlu1 %v1622_v62, %s2244_s6 }
 0x855   :  { %1655 = vrot.lane.b32.xlu1 %v1654_v63, %s2234_s19 }
 0x859   :  { %1663 = vrot.lane.b32.xlu1 %v1662_v0, %s2251_s13  ;;  %v1666_v0 = vrot.slane %v2437_v47, 4 }
 0x85d   :  { %1671 = vrot.lane.b32.xlu1 %v1670_v1, %s2248_s10 }
 0x861   :  { %1729 = vrot.lane.b32.xlu1 %v1728_v2, %s2234_s19  ;;  %v1674_v2 = vrot.slane %v2437_v47, 6 }
 0x865   :  { %1733 = vrot.lane.b32.xlu1 %v1732_v3, %s2249_s11 }
 0x869   :  { %1737 = vrot.lane.b32.xlu1 %v1736_v5, %s2251_s13  ;;  %v1802_v5 = vrot.slane %v2430_v43, 1 }
 0x86d   :  { %1741 = vrot.lane.b32.xlu1 %v1740_v8, %s2250_s12  ;;  %v1806_v8 = vrot.slane %v2430_v43, 2 }
 0x871   :  { %1745 = vrot.lane.b32.xlu1 %v1744_v12, %s2248_s10  ;;  %v1810_v12 = vrot.slane %v2430_v43, 3 }
 0x875   :  { %1749 = vrot.lane.b32.xlu1 %v1748_v14, %s2245_s7  ;;  %v1814_v14 = vrot.slane %v2430_v43, 4 }
 0x879   :  { %1753 = vrot.lane.b32.xlu1 %v1752_v15, %s2242_s30  ;;  %v1818_v15 = vrot.slane %v2430_v43, 5 }
 0x87d   :  { %1756 = vrot.lane.b32.xlu1 %v2386_v6, %s2239_s2 }
 0x881   :  { %1679 = vrot.lane.b32.xlu1 %v1678_v16, %s2242_s30  ;;  %v1822_v16 = vrot.slane %v2430_v43, 6 }
 0x89d   :  { %v1293_v17 = vpop.xlane.xlu0 %1292 }
 0x89e   :  { %v1295_v18 = vsub.f32 %v1284_v52, %v1293_v17  ;;  %v1602_v52 = vrot.slane %v2393_v10, 1  ;;  %v1826_v17 = vrot.slane %v2430_v43, 7 }
 0x8a0   :  { %v1298_v19 = vmul.f32 1.442695, %v1295_v18  ;;  %v1759_v18 = vrot.slane %v2386_v6, 1 }
 0x8a1   :  { %v1290_v20 = vpop.xlane.xlu1 %1289 }
 0x8a2   :  { %2136 = vpow2.f32 %v1298_v19  ;;  %v1294_v21 = vsub.f32 %v1206_v56, %v1290_v20 }
 0x8a4   :  { %v1296_v22 = vmul.f32 1.442695, %v1294_v21 }
 0x8a5   :  { %v1387_v23 = vpop.permute.xlu1 %1386 }
 0x8a6   :  { %2138 = vpow2.f32 %v1296_v22  ;;  %2086 = vmatpush3.msra.mxu0 %v1387_v23 }
 0x8a9   :  { %v2501_v24 = vpop.permute.xlu1 %1464 }
 0x8aa   :  { %v1486_v22 = vsel %vm144_vm2, %v2366_v44, %v2501_v24 }
 0x8ad   :  { %v1467_v25 = vpop.permute.xlu1 %1466 }
 0x8ae   :  { %v1487_v28 = vsel %vm144_vm2, %v2364_v42, %v1467_v25 }
 0x8af   :  { %v2503_v26 = vpop.eup %2136 }
 0x8b0   :  { %v1303_v27 = vsel %vm144_vm2, %v2503_v26, 0.0 }
 0x8b1   :  { %1304 = vadd.xlane.f32.xlu0 %v1303_v27  ;;  %v1475_v29 = vpop.permute.xlu1 %1474 }
 0x8b2   :  { %v2510_v30 = vsel %vm57_vm0, %v1487_v28, %v1475_v29 }
 0x8b3   :  { %v2512_v31 = vpop.eup %2138 }
 0x8b4   :  { %v1300_v32 = vsel %vm144_vm2, %v2512_v31, 0.0 }
 0x8b5   :  { %1301 = vadd.xlane.f32.xlu0 %v1300_v32  ;;  %v2516_v33 = vpop.permute.xlu1 %1576 }
 0x8b9   :  { %v2518_v34 = vpop.permute.xlu1 %1584 }
 0x8bd   :  { %v2520_v13 = vpop.permute.xlu1 %1592 }
 0x8c1   :  { %v2522_v35 = vpop.permute.xlu1 %1599 }
 0x8c5   :  { %v2524_v42 = vpop.permute.xlu1 %1607 }
 0x8c9   :  { %v2526_v36 = vpop.permute.xlu1 %1615 }
 0x8cb   :  { %1310 = vrot.lane.b32.xlu0 %v2302_v9, %s2248_s10  ;;  %v1587_v9 = vrot.slane %v2349_v39, 5 }
 0x8cd   :  { %v2530_v38 = vpop.permute.xlu1 %1623 }
 0x8cf   :  { %1472 = vrot.lane.b32.xlu0 %v2452_v51, %s2249_s11 }
 0x8d1   :  { %v2534_v40 = vpop.permute.xlu1 %1655 }
 0x8d3   :  { %1572 = vrot.lane.b32.xlu0 %v1571_v41, %s2234_s19 }
 0x8d5   :  { %v2538_v45 = vpop.permute.xlu1 %1663 }
 0x8d7   :  { %1580 = vrot.lane.b32.xlu0 %v1579_v46, %s2251_s13 }
 0x8d9   :  { %v2542_v11 = vpop.permute.xlu1 %1671 }
 0x8db   :  { %1588 = vrot.lane.b32.xlu0 %v1587_v9, %s2248_s10 }
 0x8dd   :  { %v1730_v48 = vpop.permute.xlu1 %1729 }
 0x8de   :  { %v1787_v50 = vsel %vm144_vm2, %v2342_v37, %v1730_v48 }
 0x8df   :  { %1596 = vrot.lane.b32.xlu0 %v1595_v49, %s2242_s30 }
 0x8e1   :  { %v1734_v51 = vpop.permute.xlu1 %1733 }
 0x8e2   :  { %v1788_v53 = vsel %vm57_vm0, %v1787_v50, %v1734_v51 }
 0x8e3   :  { %1603 = vrot.lane.b32.xlu0 %v1602_v52, %s2246_s8 }
 0x8e5   :  { %v1738_v54 = vpop.permute.xlu1 %1737 }
 0x8e6   :  { %v1789_v56 = vsel %vm1490_vm3, %v1788_v53, %v1738_v54 }
 0x8e7   :  { %1611 = vrot.lane.b32.xlu0 %v1610_v55, %s2240_s28 }
 0x8e9   :  { %v1742_v57 = vpop.permute.xlu1 %1741 }
 0x8ea   :  { %v1790_v37 = vsel %vm1520_vm4, %v1789_v56, %v1742_v57 }
 0x8eb   :  { %1619 = vrot.lane.b32.xlu0 %v1618_v58, %s2247_s9 }
 0x8ed   :  { %v1746_v4 = vpop.permute.xlu1 %1745 }
 0x8ee   :  { %v1791_v7 = vsel %vm1634_vm5, %v1790_v37, %v1746_v4 }
 0x8ef   :  { %1627 = vrot.lane.b32.xlu0 %v1626_v59, %s2241_s29 }
 0x8f1   :  { %v1750_v60 = vpop.permute.xlu1 %1749 }
 0x8f2   :  { %v1792_v62 = vsel %vm1636_vm6, %v1791_v7, %v1750_v60 }
 0x8f3   :  { %1659 = vrot.lane.b32.xlu0 %v1658_v61, %s2249_s11 }
 0x8f5   :  { %v1754_v63 = vpop.permute.xlu1 %1753 }
 0x8f6   :  { %v1793_v1 = vsel %vm1638_vm7, %v1792_v62, %v1754_v63 }
 0x8f7   :  { %1667 = vrot.lane.b32.xlu0 %v1666_v0, %s2250_s12 }
 0x8f9   :  { %v1757_v10 = vpop.permute.xlu1 %1756 }
 0x8fa   :  { %v2570_v3 = vsel %vm1522_vm8, %v1793_v1, %v1757_v10 }
 0x8fb   :  { %1675 = vrot.lane.b32.xlu0 %v1674_v2, %s2245_s7 }
 0x8ff   :  { %1803 = vrot.lane.b32.xlu0 %v1802_v5, %s2234_s19 }
 0x903   :  { %1807 = vrot.lane.b32.xlu0 %v1806_v8, %s2249_s11 }
 0x907   :  { %1811 = vrot.lane.b32.xlu0 %v1810_v12, %s2251_s13 }
 0x90b   :  { %1815 = vrot.lane.b32.xlu0 %v1814_v14, %s2250_s12 }
 0x90f   :  { %1819 = vrot.lane.b32.xlu0 %v1818_v15, %s2248_s10 }
 0x913   :  { %1823 = vrot.lane.b32.xlu0 %v1822_v16, %s2245_s7 }
 0x917   :  { %1827 = vrot.lane.b32.xlu0 %v1826_v17, %s2242_s30 }
 0x91b   :  { %1760 = vrot.lane.b32.xlu0 %v1759_v18, %s2246_s8 }
 0x93a   :  { %v1305_v19 = vpop.xlane.xlu0 %1304 }
 0x93b   :  { %2140 = vrcp.f32 %v1305_v19 }
 0x93e   :  { %v1302_v20 = vpop.xlane.xlu0 %1301 }
 0x93f   :  { %2142 = vrcp.f32 %v1302_v20 }
 0x942   :  { %v1311_v21 = vpop.permute.xlu0 %1310 }
 0x943   :  { %2081 = vmatpush3.msra.mxu1 %v1311_v21  ;;  %v1763_v21 = vrot.slane %v2386_v6, 2 }
 0x946   :  { %v1473_v23 = vpop.permute.xlu0 %1472 }
 0x947   :  { %v2593_v25 = vsel %vm57_vm0, %v1486_v22, %v1473_v23 }
 0x948   :  { %v2141_v27 = vpop.eup %2140 }
 0x949   :  { %v2596_v28 = vmul.f32 %v2141_v27, %v2503_v26  ;;  %v1767_v27 = vrot.slane %v2386_v6, 3 }
 0x94a   :  { %v1573_v29 = vpop.permute.xlu0 %1572 }
 0x94b   :  { %v1630_v32 = vsel %vm144_vm2, %v2349_v39, %v1573_v29  ;;  %1830 = vrot.lane.b32.xlu0 %v2596_v28, %s2239_s2  ;;  %2088 = vmatmul.mubr.msk.f32.vlgmr.msra.gmra.mxu0 %vm144_vm2, %v2596_v28  ;;  %v1833_v18 = vrot.slane %v2596_v28, 1  ;;  %v1837_v22 = vrot.slane %v2596_v28, 2  ;;  %v1841_v23 = vrot.slane %v2596_v28, 3 }
 0x94c   :  { %v2143_v41 = vpop.eup %2142  ;;  %v1631_v46 = vsel %vm57_vm0, %v1630_v32, %v2516_v33  ;;  %v1771_v29 = vrot.slane %v2386_v6, 4 }
 0x94d   :  { %v2605_v44 = vmul.f32 %v2143_v41, %v2512_v31 }
 0x94e   :  { %v1581_v24 = vpop.permute.xlu0 %1580 }
 0x94f   :  { %v1632_v26 = vsel %vm1490_vm3, %v1631_v46, %v1581_v24  ;;  %2083 = vmatmul.mubr.msk.f32.vlgmr.msra.gmra.mxu1 %vm144_vm2, %v2605_v44  ;;  %v1689_v32 = vrot.slane %v2605_v44, 2  ;;  %v1693_v41 = vrot.slane %v2605_v44, 3  ;;  %v1845_v24 = vrot.slane %v2596_v28, 4 }
 0x950   :  { %v1633_v9 = vsel %vm1520_vm4, %v1632_v26, %v2518_v34  ;;  %v1849_v46 = vrot.slane %v2596_v28, 5  ;;  %v1775_v26 = vrot.slane %v2386_v6, 5 }
 0x952   :  { %v1589_v39 = vpop.permute.xlu0 %1588 }
 0x953   :  { %v1635_v48 = vsel %vm1634_vm5, %v1633_v9, %v1589_v39  ;;  %v1779_v39 = vrot.slane %v2386_v6, 6  ;;  %v1697_v9 = vrot.slane %v2605_v44, 4 }
 0x954   :  { %v1637_v31 = vsel %vm1636_vm6, %v1635_v48, %v2520_v13  ;;  %v1701_v48 = vrot.slane %v2605_v44, 5 }
 0x956   :  { %v1597_v49 = vpop.permute.xlu0 %1596 }
 0x957   :  { %v1639_v50 = vsel %vm1638_vm7, %v1637_v31, %v1597_v49  ;;  %v1853_v49 = vrot.slane %v2596_v28, 6  ;;  %v1857_v31 = vrot.slane %v2596_v28, 7 }
 0x958   :  { %v1640_v33 = vsel %vm1522_vm8, %v1639_v50, %v2522_v35  ;;  %v1783_v50 = vrot.slane %v2386_v6, 7 }
 0x95a   :  { %v1604_v51 = vpop.permute.xlu0 %1603 }
 0x95b   :  { %v1642_v52 = vsel %vm1641_vm9, %v1640_v33, %v1604_v51  ;;  %v2698_v51 = vpop.permute.xlu1 %1679 }
 0x95c   :  { %v1644_v34 = vsel %vm1643_vm10, %v1642_v52, %v2524_v42  ;;  %v1713_v42 = vsel %vm144_vm2, %v2437_v47, %v2534_v40 }
 0x95e   :  { %v1612_v53 = vpop.permute.xlu0 %1611 }
 0x95f   :  { %v1646_v54 = vsel %vm1645_vm11, %v1644_v34, %v1612_v53 }
 0x960   :  { %v1647_v55 = vsel %vm1524_vm12, %v1646_v54, %v2526_v36 }
 0x962   :  { %v1620_v13 = vpop.permute.xlu0 %1619 }
 0x963   :  { %v1649_v56 = vsel %vm1648_vm13, %v1647_v55, %v1620_v13 }
 0x964   :  { %v1651_v57 = vsel %vm1650_vm14, %v1649_v56, %v2530_v38 }
 0x966   :  { %v1628_v35 = vpop.permute.xlu0 %1627 }
 0x967   :  { %v2630_v58 = vsel %vm1652_vm15, %v1651_v57, %v1628_v35 }
 0x96a   :  { %v1660_v37 = vpop.permute.xlu0 %1659 }
 0x96b   :  { %v1714_v4 = vsel %vm57_vm0, %v1713_v42, %v1660_v37 }
 0x96c   :  { %v1715_v36 = vsel %vm1490_vm3, %v1714_v4, %v2538_v45 }
 0x96e   :  { %v1668_v59 = vpop.permute.xlu0 %1667 }
 0x96f   :  { %v1716_v7 = vsel %vm1520_vm4, %v1715_v36, %v1668_v59 }
 0x970   :  { %v1717_v38 = vsel %vm1634_vm5, %v1716_v7, %v2542_v11 }
 0x972   :  { %v1676_v60 = vpop.permute.xlu0 %1675 }
 0x973   :  { %v2642_v61 = vsel %vm1636_vm6, %v1717_v38, %v1676_v60 }
 0x976   :  { %v1804_v62 = vpop.permute.xlu0 %1803 }
 0x977   :  { %v1861_v47 = vsel %vm144_vm2, %v2430_v43, %v1804_v62 }
 0x97a   :  { %v1808_v40 = vpop.permute.xlu0 %1807 }
 0x97b   :  { %v1862_v63 = vsel %vm57_vm0, %v1861_v47, %v1808_v40  ;;  %vm1568_vm0 = vcmask 1040384  }
 0x97e   :  { %v1812_v0 = vpop.permute.xlu0 %1811 }
 0x97f   :  { %v1863_v1 = vsel %vm1490_vm3, %v1862_v63, %v1812_v0 }
 0x982   :  { %v1816_v45 = vpop.permute.xlu0 %1815 }
 0x983   :  { %v1864_v10 = vsel %vm1520_vm4, %v1863_v1, %v1816_v45  ;;  %v1709_v45 = vrot.slane %v2605_v44, 7 }
 0x986   :  { %v1820_v2 = vpop.permute.xlu0 %1819 }
 0x987   :  { %v1865_v5 = vsel %vm1634_vm5, %v1864_v10, %v1820_v2  ;;  %v1705_v10 = vrot.slane %v2605_v44, 6 }
 0x98a   :  { %v1824_v11 = vpop.permute.xlu0 %1823 }
 0x98b   :  { %v1866_v8 = vsel %vm1636_vm6, %v1865_v5, %v1824_v11 }
 0x98e   :  { %v1828_v12 = vpop.permute.xlu0 %1827 }
 0x98f   :  { %v2652_v14 = vsel %vm1638_vm7, %v1866_v8, %v1828_v12 }
 0x992   :  { %v1761_v43 = vpop.permute.xlu0 %1760 }
 0x993   :  { %v2656_v15 = vsel %vm1641_vm9, %v2570_v3, %v1761_v43  ;;  %v1685_v3 = vrot.slane %v2605_v44, 1 }
 0x9bd   :  { %v2700_v33 = vpop.permute.xlu0 %1830 }
 0xa0b   :  { %v1458_v16 = vpop.f32.mrf.mxu0 }
 0xa0c   :  { %1482 = vrot.lane.b32.xlu1 %v1458_v16, %s2251_s13 }
 0xa0d   :  { %v2089_v17 = vpop.f32.mrf.mxu0 }
 0xa0f   :  { %v1382_v19 = vpop.f32.mrf.mxu1 }
 0xa10   :  { %1834 = vrot.lane.b32.xlu1 %v1833_v18, %s2246_s8  ;;  %1480 = vrot.lane.b32.xlu0 %v1382_v19, %s2251_s13 }
 0xa11   :  { %v2084_v20 = vpop.f32.mrf.mxu1 }
 0xa14   :  { %1764 = vrot.lane.b32.xlu1 %v1763_v21, %s2243_s5  ;;  %1682 = vrot.lane.b32.xlu0 %v2605_v44, %s2239_s2 }
 0xa18   :  { %1686 = vrot.lane.b32.xlu1 %v1685_v3, %s2246_s8  ;;  %1838 = vrot.lane.b32.xlu0 %v1837_v22, %s2243_s5 }
 0xa1c   :  { %1842 = vrot.lane.b32.xlu1 %v1841_v23, %s2240_s28  ;;  %1768 = vrot.lane.b32.xlu0 %v1767_v27, %s2240_s28 }
 0xa20   :  { %1772 = vrot.lane.b32.xlu1 %v1771_v29, %s2238_s27  ;;  %1690 = vrot.lane.b32.xlu0 %v1689_v32, %s2243_s5 }
 0xa24   :  { %1694 = vrot.lane.b32.xlu1 %v1693_v41, %s2240_s28  ;;  %1846 = vrot.lane.b32.xlu0 %v1845_v24, %s2238_s27 }
 0xa28   :  { %1850 = vrot.lane.b32.xlu1 %v1849_v46, %s2247_s9  ;;  %1776 = vrot.lane.b32.xlu0 %v1775_v26, %s2247_s9 }
 0xa2c   :  { %1780 = vrot.lane.b32.xlu1 %v1779_v39, %s2244_s6  ;;  %1698 = vrot.lane.b32.xlu0 %v1697_v9, %s2238_s27 }
 0xa30   :  { %1702 = vrot.lane.b32.xlu1 %v1701_v48, %s2247_s9  ;;  %1854 = vrot.lane.b32.xlu0 %v1853_v49, %s2244_s6 }
 0xa34   :  { %1858 = vrot.lane.b32.xlu1 %v1857_v31, %s2241_s29  ;;  %1784 = vrot.lane.b32.xlu0 %v1783_v50, %s2241_s29 }
 0xa7e   :  { %v1483_v52 = vpop.permute.xlu1 %1482 }
 0xa7f   :  { %v2704_v53 = vsel %vm1490_vm3, %v2510_v30, %v1483_v52 }
 0xa80   :  { %v1534_v34 = vrot.slane %v2704_v53, 2  ;;  %v1530_v54 = vrot.slane %v2704_v53, 1  ;;  %v1544_v13 = vrot.slane %v2704_v53, 5  ;;  %v1538_v55 = vrot.slane %v2704_v53, 3 }
 0xa81   :  { %v1552_v35 = vrot.slane %v2704_v53, 7  ;;  %v1548_v57 = vrot.slane %v2704_v53, 6  ;;  %v1542_v46 = vrot.slane %v2704_v53, 4 }
 0xa82   :  { %1535 = vrot.lane.b32.xlu1 %v1534_v34, %s2239_s2  ;;  %v2709_v6 = vpop.permute.xlu1 %1834  ;;  %1531 = vrot.lane.b32.xlu0 %v1530_v54, %s2250_s12  ;;  %v1481_v28 = vpop.permute.xlu0 %1480 }
 0xa83   :  { %v2722_v42 = vsel %vm1490_vm3, %v2593_v25, %v1481_v28 }
 0xa84   :  { %v1498_v59 = vrot.slane %v2722_v42, 2  ;;  %v1494_v36 = vrot.slane %v2722_v42, 1  ;;  %v1508_v25 = vrot.slane %v2722_v42, 5  ;;  %v1502_v38 = vrot.slane %v2722_v42, 3 }
 0xa85   :  { %v1516_v40 = vrot.slane %v2722_v42, 7  ;;  %v1512_v63 = vrot.slane %v2722_v42, 6 }
 0xa86   :  { %1545 = vrot.lane.b32.xlu1 %v1544_v13, %s2250_s12  ;;  %v1765_v56 = vpop.permute.xlu1 %1764  ;;  %1539 = vrot.lane.b32.xlu0 %v1538_v55, %s2238_s27  ;;  %v2716_v30 = vpop.permute.xlu0 %1682 }
 0xa87   :  { %v1796_v8 = vsel %vm1643_vm10, %v2656_v15, %v1765_v56 }
 0xa8a   :  { %1553 = vrot.lane.b32.xlu1 %v1552_v35, %s2238_s27  ;;  %v2725_v37 = vpop.permute.xlu1 %1686  ;;  %1549 = vrot.lane.b32.xlu0 %v1548_v57, %s2239_s2  ;;  %v1839_v4 = vpop.permute.xlu0 %1838 }
 0xa8e   :  { %v1843_v7 = vpop.permute.xlu1 %1842  ;;  %1499 = vrot.lane.b32.xlu1 %v1498_v59, %s2239_s2  ;;  %1495 = vrot.lane.b32.xlu0 %v1494_v36, %s2250_s12  ;;  %v1769_v60 = vpop.permute.xlu0 %1768 }
 0xa8f   :  { %v1797_v43 = vsel %vm1645_vm11, %v1796_v8, %v1769_v60 }
 0xa92   :  { %v1773_v62 = vpop.permute.xlu1 %1772  ;;  %1509 = vrot.lane.b32.xlu1 %v1508_v25, %s2250_s12  ;;  %1503 = vrot.lane.b32.xlu0 %v1502_v38, %s2238_s27  ;;  %v1691_v47 = vpop.permute.xlu0 %1690 }
 0xa93   :  { %v1798_v17 = vsel %vm1524_vm12, %v1797_v43, %v1773_v62 }
 0xa96   :  { %1517 = vrot.lane.b32.xlu1 %v1516_v40, %s2238_s27  ;;  %1513 = vrot.lane.b32.xlu0 %v1512_v63, %s2239_s2  ;;  %v1847_v0 = vpop.permute.xlu0 %1846  ;;  %v2740_v1 = vpop.permute.xlu1 %1694 }
 0xa9a   :  { %1710 = vrot.lane.b32.xlu1 %v1709_v45, %s2241_s29  ;;  %1706 = vrot.lane.b32.xlu0 %v1705_v10, %s2244_s6  ;;  %v1777_v2 = vpop.permute.xlu0 %1776  ;;  %v1851_v5 = vpop.permute.xlu1 %1850 }
 0xa9b   :  { %v1799_v18 = vsel %vm1648_vm13, %v1798_v17, %v1777_v2 }
 0xa9e   :  { %v1699_v11 = vpop.permute.xlu0 %1698  ;;  %v1781_v16 = vpop.permute.xlu1 %1780 }
 0xa9f   :  { %v1800_v44 = vsel %vm1650_vm14, %v1799_v18, %v1781_v16 }
 0xaa2   :  { %v1855_v12 = vpop.permute.xlu0 %1854  ;;  %v1703_v15 = vpop.permute.xlu1 %1702 }
 0xaa6   :  { %v1785_v19 = vpop.permute.xlu0 %1784  ;;  %v1859_v22 = vpop.permute.xlu1 %1858 }
 0xaa7   :  { %v1801_v20 = vsel %vm1652_vm15, %v1800_v44, %v1785_v19 }
 0xaa8   :  { %v1878_v21 = vrot.slane %v1801_v20, 7 }
 0xaaa   :  { %v2755_v3 = vsel %vm1568_vm0, %v2630_v58, %v1878_v21  ;;  %v1868_v58 = vsel %vm1522_vm8, %v2652_v14, %v2700_v33  ;;  %v1506_v14 = vrot.slane %v2722_v42, 4 }
 0xaab   :  { %v1869_v31 = vsel %vm1641_vm9, %v1868_v58, %v2709_v6 }
 0xaac   :  { %v1870_v54 = vsel %vm1643_vm10, %v1869_v31, %v1839_v4 }
 0xaad   :  { %v1871_v6 = vsel %vm1645_vm11, %v1870_v54, %v1843_v7 }
 0xaf4   :  { %v1536_v23 = vpop.permute.xlu1 %1535  ;;  %v1532_v27 = vpop.permute.xlu0 %1531 }
 0xaf5   :  { %v1556_v9 = vsel %vm1520_vm4, %v2704_v53, %v1532_v27  ;;  %v1719_v53 = vsel %vm1638_vm7, %v2642_v61, %v2698_v51  ;;  %v1872_v61 = vsel %vm1524_vm12, %v1871_v6, %v1847_v0 }
 0xaf6   :  { %v1557_v28 = vsel %vm1522_vm8, %v1556_v9, %v1536_v23  ;;  %v1720_v33 = vsel %vm1522_vm8, %v1719_v53, %v2716_v30  ;;  %v1873_v57 = vsel %vm1648_vm13, %v1872_v61, %v1851_v5 }
 0xaf7   :  { %v1721_v56 = vsel %vm1641_vm9, %v1720_v33, %v2725_v37  ;;  %v1874_v36 = vsel %vm1650_vm14, %v1873_v57, %v1855_v12 }
 0xaf8   :  { %v1546_v29 = vpop.permute.xlu1 %1545  ;;  %v1540_v32 = vpop.permute.xlu0 %1539  ;;  %v1722_v35 = vsel %vm1643_vm10, %v1721_v56, %v1691_v47  ;;  %v1875_v38 = vsel %vm1652_vm15, %v1874_v36, %v1859_v22 }
 0xaf9   :  { %v1559_v48 = vsel %vm1520_vm4, %v1542_v46, %v1546_v29  ;;  %v1558_v13 = vsel %vm1524_vm12, %v1557_v28, %v1540_v32  ;;  %v1723_v25 = vsel %vm1645_vm11, %v1722_v35, %v2740_v1  ;;  %v1879_v5 = vrot.slane %v1875_v38, 7 }
 0xafa   :  { %v1564_v7 = vrot.slane %v1558_v13, 7  ;;  %v1724_v47 = vsel %vm1524_vm12, %v1723_v25, %v1699_v11 }
 0xafb   :  { %v1725_v0 = vsel %vm1648_vm13, %v1724_v47, %v1703_v15 }
 0xafc   :  { %v1554_v41 = vpop.permute.xlu1 %1553  ;;  %v1550_v24 = vpop.permute.xlu0 %1549 }
 0xafd   :  { %v1560_v49 = vsel %vm1522_vm8, %v1559_v48, %v1550_v24 }
 0xafe   :  { %v1561_v55 = vsel %vm1524_vm12, %v1560_v49, %v1554_v41 }
 0xaff   :  { %v1565_v60 = vrot.slane %v1561_v55, 7 }
 0xb00   :  { %v1500_v26 = vpop.permute.xlu1 %1499  ;;  %v1496_v39 = vpop.permute.xlu0 %1495 }
 0xb01   :  { %v1521_v50 = vsel %vm1520_vm4, %v2722_v42, %v1496_v39 }
 0xb02   :  { %v1523_v51 = vsel %vm1522_vm8, %v1521_v50, %v1500_v26 }
 0xb04   :  { %v1510_v52 = vpop.permute.xlu1 %1509  ;;  %v1504_v34 = vpop.permute.xlu0 %1503 }
 0xb05   :  { %v1526_v42 = vsel %vm1520_vm4, %v1506_v14, %v1510_v52  ;;  %v1525_v30 = vsel %vm1524_vm12, %v1523_v51, %v1504_v34 }
 0xb06   :  { %v1569_v40 = vsel %vm1568_vm0, %v1525_v30, %v1564_v7 }
 0xb08   :  { %v1518_v4 = vpop.permute.xlu1 %1517  ;;  %v1514_v59 = vpop.permute.xlu0 %1513 }
 0xb09   :  { %v1527_v37 = vsel %vm1522_vm8, %v1526_v42, %v1514_v59 }
 0xb0a   :  { %v1528_v62 = vsel %vm1524_vm12, %v1527_v37, %v1518_v4 }
 0xb0b   :  { %v1570_v63 = vsel %vm1568_vm0, %v1528_v62, %v1565_v60 }
 0xb0c   :  { %v1711_v45 = vpop.permute.xlu1 %1710  ;;  %v1707_v10 = vpop.permute.xlu0 %1706  ;;  %v1886_v2 = vcombine.low %v1569_v40, %v1570_v63 }
 0xb0d   :  { %v1726_v8 = vsel %vm1650_vm14, %v1725_v0, %v1707_v10 }
 0xb0e   :  { %v1727_v1 = vsel %vm1652_vm15, %v1726_v8, %v1711_v45  ;;  %1965 = vst.sshfl [vmem:[#allocation7] sm:$0x33 pattern:$0x76325410] %v1886_v2 }
 0xb0f   :  { %2195 = shalt.err (!%p2192_p0)
}
 0xb10   :  { %1917 = dma.vmem_to_hbm [thread:$0]  %s1915_s15, 64, %s2811_s3, [#allocation4]   ;;  %v1883_v11 = vsel %vm1568_vm0, %v1727_v1, %v1879_v5 }
 0xb11   :  { %v1898_v12 = vcombine.low %v2755_v3, %v1883_v11  ;;  %s2204_s21 = scalar_lea.vmem %s1925_s17, 64  ;;  %p2209_p2 = scmp.lt.s32.totalorder %s1925_s17, %s1925_s17 }
 0xb12   :  { %p2205_p1 = scmp.ne.s32.totalorder %s1925_s17, %s2204_s21  ;;  %p2210_p3 = scmp.lt.s32.totalorder %s2204_s21, %s2204_s21 }
 0xb13   :  { %1966 = vst.sshfl [vmem:[#allocation8] sm:$0x33 pattern:$0x76325410] %v1898_v12 }
 0xb14   :  { %p2211_p4 = por %p2210_p3, %p2209_p2 }
 0xb16   :  { %p2212_p5 = pnand %p2211_p4, %p2205_p1 }
 0xb18   :  { %2215 = shalt.err (!%p2212_p5)
}
 0xb19   :  { %1927 = dma.vmem_to_hbm [thread:$0]  %s1925_s17, 64, %s2812_s4, [#allocation9]  }
 0xb1a   :  { %2228 = dma.done.wait [#allocation4], 64  }
 0xb1b   :  { %2229 = vsyncadd [#allocation4], 4294967232 }
 0xb1c   :  { %2230 = dma.done.wait [#allocation9], 64  }
 0xb1d   :  { %2231 = vsyncadd [#allocation9], 4294967232 }
 0xb1e   :  { %1934 = vsyncpa [#allocation3], 1 }
 0xb1f   :  { %1935 = vsyncpa [#allocation6], 1 }
 0xb20   :  { %1936 = vsyncpa [#allocation4], 1 }
 0xb21   :  { %1937 = vsyncpa [#allocation9], 1 }

</bundles_post_ra>
